<compile_context>
chip_gen: v5e
topology: v5e:2x2
jax: 0.10.0
libtpu: 0.0.40
codegen_flags: <defaults>
</compile_context>

<pallas_src>
import functools
import string

import jax
import jax.numpy as jnp
import numpy as np
from jax.experimental import pallas as pl
from jax.experimental.pallas import tpu as pltpu

VOCAB = list(string.ascii_lowercase + " ")
VOCAB_SIZE = len(VOCAB)   # 27
NUM_EXPERTS = 10


# ----------- fused embedding + LSTM + gating + experts + combine kernel -----
def _moe_fused_kernel(tok_ref, emb_ref, w_ih_ref, w_hh_ref, b_ref,
                      w_exp_ref, b_exp_ref, w_gate_ref, b_gate_ref,
                      expert_ref, combined_ref, gw_ref,
                      *, T, B, H, NE, V):
    TB = T * B

    # (1) Embedding lookup as one-hot @ table (single tiny MXU matmul).
    #     tok_ref rows are time-major (row = t*B + b).
    tok = tok_ref[...]                                              # (TB, 1) i32
    onehot = (tok == jax.lax.broadcasted_iota(jnp.int32, (TB, V), 1)
              ).astype(jnp.float32)                                 # (TB, V)
    x = jnp.dot(onehot, emb_ref[...], preferred_element_type=jnp.float32)

    # (2) Input projection for ALL timesteps in one MXU matmul: (TB, 4H).
    gates_x = (jnp.dot(x, w_ih_ref[...],
                       preferred_element_type=jnp.float32) + b_ref[...])
    w_hh = w_hh_ref[...]

    # (3) Fully-unrolled LSTM recurrence; each step only does the recurrent
    #     matmul h @ w_hh plus elementwise gate math.
    h = jnp.zeros((B, H), jnp.float32)
    c = jnp.zeros((B, H), jnp.float32)
    hs = []
    for t in range(T):
        g = gates_x[t * B:(t + 1) * B, :] + jnp.dot(
            h, w_hh, preferred_element_type=jnp.float32)
        i_g = jax.nn.sigmoid(g[:, 0:H])
        f_g = jax.nn.sigmoid(g[:, H:2 * H])
        c_g = jnp.tanh(g[:, 2 * H:3 * H])
        o_g = jax.nn.sigmoid(g[:, 3 * H:4 * H])
        c = f_g * c + i_g * c_g
        h = o_g * jnp.tanh(c)
        hs.append(h)

    # Time-major hidden-state slab (TB, H): row index = t*B + b.
    h_all = jnp.concatenate(hs, axis=0)

    # (4) Gating softmax from the last timestep's hidden state (lengths=None
    #     => x[:, -1, :] == h).
    logits = (jnp.dot(h, w_gate_ref[...],
                      preferred_element_type=jnp.float32) + b_gate_ref[...])
    m = jnp.max(logits, axis=-1, keepdims=True)
    z = jnp.exp(logits - m)
    gw = z / jnp.sum(z, axis=-1, keepdims=True)
    gw_ref[...] = gw

    # (5) All NE expert projections in ONE lane-dense matmul -> (TB, NE*V).
    out = (jnp.dot(h_all, w_exp_ref[...],
                   preferred_element_type=jnp.float32) + b_exp_ref[...])
    expert_ref[...] = out

    # (6) Gated combine: rows are time-major, so row t*B + b uses gw[b].
    gw_rows = jnp.concatenate([gw] * T, axis=0)                     # (TB, NE)
    combined = out[:, 0:V] * gw_rows[:, 0:1]
    for e in range(1, NE):
        combined = combined + out[:, e * V:(e + 1) * V] * gw_rows[:, e:e + 1]
    combined_ref[...] = combined


def moe_fused_call(tokens_tm, emb, w_ih, w_hh, b_lstm, w_exp_f, b_exp_f,
                   w_gate, b_gate2, *, T, B, NE, V):
    TB = T * B
    E = emb.shape[1]
    H = w_hh.shape[0]
    kernel = functools.partial(_moe_fused_kernel, T=T, B=B, H=H, NE=NE, V=V)
    return pl.pallas_call(
        kernel,
        out_shape=(
            jax.ShapeDtypeStruct((TB, NE * V), jnp.float32),  # expert slab
            jax.ShapeDtypeStruct((TB, V), jnp.float32),       # combined (time-major rows)
            jax.ShapeDtypeStruct((B, NE), jnp.float32),       # gating weights
        ),
        grid_spec=pltpu.PrefetchScalarGridSpec(
            num_scalar_prefetch=0,
            grid=(1,),
            in_specs=[
                pl.BlockSpec((TB, 1), lambda i: (0, 0)),        # tokens (time-major)
                pl.BlockSpec((V, E), lambda i: (0, 0)),         # embedding table
                pl.BlockSpec((E, 4 * H), lambda i: (0, 0)),
                pl.BlockSpec((H, 4 * H), lambda i: (0, 0)),
                pl.BlockSpec((1, 4 * H), lambda i: (0, 0)),
                pl.BlockSpec((H, NE * V), lambda i: (0, 0)),
                pl.BlockSpec((1, NE * V), lambda i: (0, 0)),
                pl.BlockSpec((H, NE), lambda i: (0, 0)),
                pl.BlockSpec((1, NE), lambda i: (0, 0)),
            ],
            out_specs=(
                pl.BlockSpec((TB, NE * V), lambda i: (0, 0)),
                pl.BlockSpec((TB, V), lambda i: (0, 0)),
                pl.BlockSpec((B, NE), lambda i: (0, 0)),
            ),
        ),
        compiler_params=pltpu.CompilerParams(
            dimension_semantics=("arbitrary",)),
    )(tokens_tm, emb, w_ih, w_hh, b_lstm, w_exp_f, b_exp_f, w_gate, b_gate2)


# ------------------------------- wrapper ------------------------------------
@jax.jit
def moe_module_forward(tokens, params):
    B, T = tokens.shape
    H = params["w_hh"].shape[0]
    NE, _, V = params["w_exp"].shape

    # Time-major token rows (row = t*B + b), as a (TB, 1) int32 column.
    tokens_tm = tokens.T.reshape(T * B, 1).astype(jnp.int32)

    b_lstm = (params["b_ih"] + params["b_hh"]).reshape(1, 4 * H)
    w_exp_f = jnp.transpose(params["w_exp"], (1, 0, 2)).reshape(H, NE * V)
    b_exp_f = params["b_exp"].reshape(1, NE * V)
    b_gate2 = params["b_gate"].reshape(1, NE)

    expert2d, combined2d, gw = moe_fused_call(
        tokens_tm, params["embedding"], params["w_ih"], params["w_hh"],
        b_lstm, w_exp_f, b_exp_f, params["w_gate"], b_gate2,
        T=T, B=B, NE=NE, V=V)

    combined = combined2d.reshape(T, B, V).transpose(1, 0, 2)          # (B, T, V)
    expert_out = expert2d.reshape(T, B, NE, V).transpose(2, 1, 0, 3)   # (NE, B, T, V)
    return combined, expert_out, gw


# --------------------------- pure-JAX reference ------------------------------
def reference_forward(tokens, params):
    emb = params["embedding"][tokens]                 # (B, T, E)
    H = params["w_hh"].shape[0]
    B = tokens.shape[0]
    b = params["b_ih"] + params["b_hh"]

    def step(carry, x_t):
        h, c = carry
        gates = x_t @ params["w_ih"] + h @ params["w_hh"] + b
        i = jax.nn.sigmoid(gates[:, :H])
        f = jax.nn.sigmoid(gates[:, H:2 * H])
        g = jnp.tanh(gates[:, 2 * H:3 * H])
        o = jax.nn.sigmoid(gates[:, 3 * H:])
        c = f * c + i * g
        h = o * jnp.tanh(c)
        return (h, c), h

    x_tbe = jnp.transpose(emb, (1, 0, 2))
    init = (jnp.zeros((B, H), jnp.float32), jnp.zeros((B, H), jnp.float32))
    _, hs = jax.lax.scan(step, init, x_tbe)
    hs_bth = jnp.transpose(hs, (1, 0, 2))             # (B, T, H)
    expert_out = (jnp.einsum("bth,ehv->ebtv", hs_bth, params["w_exp"])
                  + params["b_exp"][:, None, None, :])
    logits = hs_bth[:, -1, :] @ params["w_gate"] + params["b_gate"]
    gw = jax.nn.softmax(logits, axis=-1)
    combined = jnp.einsum("be,ebtv->btv", gw, expert_out)
    return combined, expert_out, gw


def init_params(key, vocab_size, embed_size, hidden_size, num_experts):
    ks = jax.random.split(key, 10)
    kh = 1.0 / np.sqrt(hidden_size)
    return {
        "embedding": jax.random.normal(ks[0], (vocab_size, embed_size), jnp.float32),
        "w_ih": jax.random.uniform(ks[1], (embed_size, 4 * hidden_size), jnp.float32, -kh, kh),
        "w_hh": jax.random.uniform(ks[2], (hidden_size, 4 * hidden_size), jnp.float32, -kh, kh),
        "b_ih": jax.random.uniform(ks[3], (4 * hidden_size,), jnp.float32, -kh, kh),
        "b_hh": jax.random.uniform(ks[4], (4 * hidden_size,), jnp.float32, -kh, kh),
        "w_exp": jax.random.uniform(ks[5], (num_experts, hidden_size, vocab_size), jnp.float32, -kh, kh),
        "b_exp": jax.random.uniform(ks[6], (num_experts, vocab_size), jnp.float32, -kh, kh),
        "w_gate": jax.random.uniform(ks[7], (hidden_size, num_experts), jnp.float32, -kh, kh),
        "b_gate": jax.random.uniform(ks[8], (num_experts,), jnp.float32, -kh, kh),
    }


if __name__ == "__main__":
    B, T = 2, 8
    embed_size, hidden_size = 16, 32

    key = jax.random.PRNGKey(0)
    k_tok, k_par = jax.random.split(key)
    tokens = jax.random.randint(k_tok, (B, T), 0, VOCAB_SIZE, dtype=jnp.int32)
    params = init_params(k_par, VOCAB_SIZE, embed_size, hidden_size, NUM_EXPERTS)

    combined, expert_out, gw = moe_module_forward(tokens, params)
    jax.block_until_ready((combined, expert_out, gw))

    ref_combined, ref_expert, ref_gw = reference_forward(tokens, params)
    np.testing.assert_allclose(np.asarray(combined), np.asarray(ref_combined),
                               rtol=1e-4, atol=1e-4)
    np.testing.assert_allclose(np.asarray(expert_out), np.asarray(ref_expert),
                               rtol=1e-4, atol=1e-4)
    np.testing.assert_allclose(np.asarray(gw), np.asarray(ref_gw),
                               rtol=1e-4, atol=1e-4)

    print("KERNEL_OK")
</pallas_src>

<mosaic_0001>
module attributes {stable_mosaic.version = 11 : i64} {
  func.func @_moe_fused_kernel(%arg0: i32, %arg1: memref<16x1xi32, #tpu.memory_space<vmem>>, %arg2: memref<27x16xf32, #tpu.memory_space<vmem>>, %arg3: memref<16x128xf32, #tpu.memory_space<vmem>>, %arg4: memref<32x128xf32, #tpu.memory_space<vmem>>, %arg5: memref<1x128xf32, #tpu.memory_space<vmem>>, %arg6: memref<32x270xf32, #tpu.memory_space<vmem>>, %arg7: memref<1x270xf32, #tpu.memory_space<vmem>>, %arg8: memref<32x10xf32, #tpu.memory_space<vmem>>, %arg9: memref<1x10xf32, #tpu.memory_space<vmem>>, %arg10: memref<16x270xf32, #tpu.memory_space<vmem>>, %arg11: memref<16x27xf32, #tpu.memory_space<vmem>>, %arg12: memref<2x10xf32, #tpu.memory_space<vmem>>) attributes {dimension_semantics = [#tpu.dimension_semantics<arbitrary>], iteration_bounds = array<i64: 1>, scalar_prefetch = 0 : i64, scratch_operands = 0 : i64, tpu.core_type = #tpu.core_type<tc>, window_params = [{pipeline_mode = #tpu.pipeline_mode<synchronous>, transform_indices = @transform_0, window_bounds = array<i64: 16, 1>}, {pipeline_mode = #tpu.pipeline_mode<synchronous>, transform_indices = @transform_1, window_bounds = array<i64: 27, 16>}, {pipeline_mode = #tpu.pipeline_mode<synchronous>, transform_indices = @transform_2, window_bounds = array<i64: 16, 128>}, {pipeline_mode = #tpu.pipeline_mode<synchronous>, transform_indices = @transform_3, window_bounds = array<i64: 32, 128>}, {pipeline_mode = #tpu.pipeline_mode<synchronous>, transform_indices = @transform_4, window_bounds = array<i64: 1, 128>}, {pipeline_mode = #tpu.pipeline_mode<synchronous>, transform_indices = @transform_5, window_bounds = array<i64: 32, 270>}, {pipeline_mode = #tpu.pipeline_mode<synchronous>, transform_indices = @transform_6, window_bounds = array<i64: 1, 270>}, {pipeline_mode = #tpu.pipeline_mode<synchronous>, transform_indices = @transform_7, window_bounds = array<i64: 32, 10>}, {pipeline_mode = #tpu.pipeline_mode<synchronous>, transform_indices = @transform_8, window_bounds = array<i64: 1, 10>}, {pipeline_mode = #tpu.pipeline_mode<synchronous>, transform_indices = @transform_9, window_bounds = array<i64: 16, 270>}, {pipeline_mode = #tpu.pipeline_mode<synchronous>, transform_indices = @transform_10, window_bounds = array<i64: 16, 27>}, {pipeline_mode = #tpu.pipeline_mode<synchronous>, transform_indices = @transform_11, window_bounds = array<i64: 2, 10>}]} {
    %c0 = arith.constant 0 : index
    %c0_0 = arith.constant 0 : index
    %0 = vector.load %arg1[%c0, %c0_0] : memref<16x1xi32, #tpu.memory_space<vmem>>, vector<16x1xi32>
    %1 = tpu.iota {dimensions = array<i32: 1>} : vector<16x27xi32>
    %2 = vector.broadcast %0 : vector<16x1xi32> to vector<16x27xi32>
    %3 = arith.cmpi eq, %2, %1 : vector<16x27xi32>
    %4 = arith.extui %3 : vector<16x27xi1> to vector<16x27xi32>
    %5 = arith.sitofp %4 : vector<16x27xi32> to vector<16x27xf32>
    %c0_1 = arith.constant 0 : index
    %c0_2 = arith.constant 0 : index
    %6 = vector.load %arg2[%c0_1, %c0_2] : memref<27x16xf32, #tpu.memory_space<vmem>>, vector<27x16xf32>
    %cst = arith.constant dense<0.000000e+00> : vector<16x16xf32>
    %7 = tpu.matmul %5, %6, %cst {dimension_numbers = #tpu.dot_dimension_numbers<[1], [0], [0], [1], [0, 0, 1, 1], [], []>} : vector<16x27xf32>, vector<27x16xf32>, vector<16x16xf32> -> vector<16x16xf32>
    %c0_3 = arith.constant 0 : index
    %c0_4 = arith.constant 0 : index
    %8 = vector.load %arg3[%c0_3, %c0_4] : memref<16x128xf32, #tpu.memory_space<vmem>>, vector<16x128xf32>
    %cst_5 = arith.constant dense<0.000000e+00> : vector<16x128xf32>
    %9 = tpu.matmul %7, %8, %cst_5 {dimension_numbers = #tpu.dot_dimension_numbers<[1], [0], [0], [1], [0, 0, 1, 1], [], []>} : vector<16x16xf32>, vector<16x128xf32>, vector<16x128xf32> -> vector<16x128xf32>
    %c0_6 = arith.constant 0 : index
    %c0_7 = arith.constant 0 : index
    %10 = vector.load %arg5[%c0_6, %c0_7] : memref<1x128xf32, #tpu.memory_space<vmem>>, vector<1x128xf32>
    %11 = vector.broadcast %10 : vector<1x128xf32> to vector<16x128xf32>
    %12 = arith.addf %9, %11 : vector<16x128xf32>
    %c0_8 = arith.constant 0 : index
    %c0_9 = arith.constant 0 : index
    %13 = vector.load %arg4[%c0_8, %c0_9] : memref<32x128xf32, #tpu.memory_space<vmem>>, vector<32x128xf32>
    %cst_10 = arith.constant 0.000000e+00 : f32
    %14 = vector.broadcast %cst_10 : f32 to vector<2x32xf32>
    %cst_11 = arith.constant 0.000000e+00 : f32
    %15 = vector.broadcast %cst_11 : f32 to vector<2x32xf32>
    %16 = vector.extract_strided_slice %12 {offsets = [0, 0], sizes = [2, 128], strides = [1, 1]} : vector<16x128xf32> to vector<2x128xf32>
    %cst_12 = arith.constant dense<0.000000e+00> : vector<2x128xf32>
    %17 = tpu.matmul %14, %13, %cst_12 {dimension_numbers = #tpu.dot_dimension_numbers<[1], [0], [0], [1], [0, 0, 1, 1], [], []>} : vector<2x32xf32>, vector<32x128xf32>, vector<2x128xf32> -> vector<2x128xf32>
    %18 = arith.addf %16, %17 : vector<2x128xf32>
    %19 = vector.extract_strided_slice %18 {offsets = [0, 0], sizes = [2, 32], strides = [1, 1]} : vector<2x128xf32> to vector<2x32xf32>
    %20 = arith.negf %19 : vector<2x32xf32>
    %21 = math.exp %20 : vector<2x32xf32>
    %cst_13 = arith.constant 1.000000e+00 : f32
    %22 = vector.broadcast %cst_13 : f32 to vector<2x32xf32>
    %23 = arith.addf %22, %21 : vector<2x32xf32>
    %24 = arith.divf %22, %23 : vector<2x32xf32>
    %25 = vector.extract_strided_slice %18 {offsets = [0, 32], sizes = [2, 32], strides = [1, 1]} : vector<2x128xf32> to vector<2x32xf32>
    %26 = arith.negf %25 : vector<2x32xf32>
    %27 = math.exp %26 : vector<2x32xf32>
    %cst_14 = arith.constant 1.000000e+00 : f32
    %28 = vector.broadcast %cst_14 : f32 to vector<2x32xf32>
    %29 = arith.addf %28, %27 : vector<2x32xf32>
    %30 = arith.divf %28, %29 : vector<2x32xf32>
    %31 = vector.extract_strided_slice %18 {offsets = [0, 64], sizes = [2, 32], strides = [1, 1]} : vector<2x128xf32> to vector<2x32xf32>
    %32 = math.tanh %31 : vector<2x32xf32>
    %33 = vector.extract_strided_slice %18 {offsets = [0, 96], sizes = [2, 32], strides = [1, 1]} : vector<2x128xf32> to vector<2x32xf32>
    %34 = arith.negf %33 : vector<2x32xf32>
    %35 = math.exp %34 : vector<2x32xf32>
    %cst_15 = arith.constant 1.000000e+00 : f32
    %36 = vector.broadcast %cst_15 : f32 to vector<2x32xf32>
    %37 = arith.addf %36, %35 : vector<2x32xf32>
    %38 = arith.divf %36, %37 : vector<2x32xf32>
    %39 = arith.mulf %30, %15 : vector<2x32xf32>
    %40 = arith.mulf %24, %32 : vector<2x32xf32>
    %41 = arith.addf %39, %40 : vector<2x32xf32>
    %42 = math.tanh %41 : vector<2x32xf32>
    %43 = arith.mulf %38, %42 : vector<2x32xf32>
    %44 = vector.extract_strided_slice %12 {offsets = [2, 0], sizes = [2, 128], strides = [1, 1]} : vector<16x128xf32> to vector<2x128xf32>
    %cst_16 = arith.constant dense<0.000000e+00> : vector<2x128xf32>
    %45 = tpu.matmul %43, %13, %cst_16 {dimension_numbers = #tpu.dot_dimension_numbers<[1], [0], [0], [1], [0, 0, 1, 1], [], []>} : vector<2x32xf32>, vector<32x128xf32>, vector<2x128xf32> -> vector<2x128xf32>
    %46 = arith.addf %44, %45 : vector<2x128xf32>
    %47 = vector.extract_strided_slice %46 {offsets = [0, 0], sizes = [2, 32], strides = [1, 1]} : vector<2x128xf32> to vector<2x32xf32>
    %48 = arith.negf %47 : vector<2x32xf32>
    %49 = math.exp %48 : vector<2x32xf32>
    %cst_17 = arith.constant 1.000000e+00 : f32
    %50 = vector.broadcast %cst_17 : f32 to vector<2x32xf32>
    %51 = arith.addf %50, %49 : vector<2x32xf32>
    %52 = arith.divf %50, %51 : vector<2x32xf32>
    %53 = vector.extract_strided_slice %46 {offsets = [0, 32], sizes = [2, 32], strides = [1, 1]} : vector<2x128xf32> to vector<2x32xf32>
    %54 = arith.negf %53 : vector<2x32xf32>
    %55 = math.exp %54 : vector<2x32xf32>
    %cst_18 = arith.constant 1.000000e+00 : f32
    %56 = vector.broadcast %cst_18 : f32 to vector<2x32xf32>
    %57 = arith.addf %56, %55 : vector<2x32xf32>
    %58 = arith.divf %56, %57 : vector<2x32xf32>
    %59 = vector.extract_strided_slice %46 {offsets = [0, 64], sizes = [2, 32], strides = [1, 1]} : vector<2x128xf32> to vector<2x32xf32>
    %60 = math.tanh %59 : vector<2x32xf32>
    %61 = vector.extract_strided_slice %46 {offsets = [0, 96], sizes = [2, 32], strides = [1, 1]} : vector<2x128xf32> to vector<2x32xf32>
    %62 = arith.negf %61 : vector<2x32xf32>
    %63 = math.exp %62 : vector<2x32xf32>
    %cst_19 = arith.constant 1.000000e+00 : f32
    %64 = vector.broadcast %cst_19 : f32 to vector<2x32xf32>
    %65 = arith.addf %64, %63 : vector<2x32xf32>
    %66 = arith.divf %64, %65 : vector<2x32xf32>
    %67 = arith.mulf %58, %41 : vector<2x32xf32>
    %68 = arith.mulf %52, %60 : vector<2x32xf32>
    %69 = arith.addf %67, %68 : vector<2x32xf32>
    %70 = math.tanh %69 : vector<2x32xf32>
    %71 = arith.mulf %66, %70 : vector<2x32xf32>
    %72 = vector.extract_strided_slice %12 {offsets = [4, 0], sizes = [2, 128], strides = [1, 1]} : vector<16x128xf32> to vector<2x128xf32>
    %cst_20 = arith.constant dense<0.000000e+00> : vector<2x128xf32>
    %73 = tpu.matmul %71, %13, %cst_20 {dimension_numbers = #tpu.dot_dimension_numbers<[1], [0], [0], [1], [0, 0, 1, 1], [], []>} : vector<2x32xf32>, vector<32x128xf32>, vector<2x128xf32> -> vector<2x128xf32>
    %74 = arith.addf %72, %73 : vector<2x128xf32>
    %75 = vector.extract_strided_slice %74 {offsets = [0, 0], sizes = [2, 32], strides = [1, 1]} : vector<2x128xf32> to vector<2x32xf32>
    %76 = arith.negf %75 : vector<2x32xf32>
    %77 = math.exp %76 : vector<2x32xf32>
    %cst_21 = arith.constant 1.000000e+00 : f32
    %78 = vector.broadcast %cst_21 : f32 to vector<2x32xf32>
    %79 = arith.addf %78, %77 : vector<2x32xf32>
    %80 = arith.divf %78, %79 : vector<2x32xf32>
    %81 = vector.extract_strided_slice %74 {offsets = [0, 32], sizes = [2, 32], strides = [1, 1]} : vector<2x128xf32> to vector<2x32xf32>
    %82 = arith.negf %81 : vector<2x32xf32>
    %83 = math.exp %82 : vector<2x32xf32>
    %cst_22 = arith.constant 1.000000e+00 : f32
    %84 = vector.broadcast %cst_22 : f32 to vector<2x32xf32>
    %85 = arith.addf %84, %83 : vector<2x32xf32>
    %86 = arith.divf %84, %85 : vector<2x32xf32>
    %87 = vector.extract_strided_slice %74 {offsets = [0, 64], sizes = [2, 32], strides = [1, 1]} : vector<2x128xf32> to vector<2x32xf32>
    %88 = math.tanh %87 : vector<2x32xf32>
    %89 = vector.extract_strided_slice %74 {offsets = [0, 96], sizes = [2, 32], strides = [1, 1]} : vector<2x128xf32> to vector<2x32xf32>
    %90 = arith.negf %89 : vector<2x32xf32>
    %91 = math.exp %90 : vector<2x32xf32>
    %cst_23 = arith.constant 1.000000e+00 : f32
    %92 = vector.broadcast %cst_23 : f32 to vector<2x32xf32>
    %93 = arith.addf %92, %91 : vector<2x32xf32>
    %94 = arith.divf %92, %93 : vector<2x32xf32>
    %95 = arith.mulf %86, %69 : vector<2x32xf32>
    %96 = arith.mulf %80, %88 : vector<2x32xf32>
    %97 = arith.addf %95, %96 : vector<2x32xf32>
    %98 = math.tanh %97 : vector<2x32xf32>
    %99 = arith.mulf %94, %98 : vector<2x32xf32>
    %100 = vector.extract_strided_slice %12 {offsets = [6, 0], sizes = [2, 128], strides = [1, 1]} : vector<16x128xf32> to vector<2x128xf32>
    %cst_24 = arith.constant dense<0.000000e+00> : vector<2x128xf32>
    %101 = tpu.matmul %99, %13, %cst_24 {dimension_numbers = #tpu.dot_dimension_numbers<[1], [0], [0], [1], [0, 0, 1, 1], [], []>} : vector<2x32xf32>, vector<32x128xf32>, vector<2x128xf32> -> vector<2x128xf32>
    %102 = arith.addf %100, %101 : vector<2x128xf32>
    %103 = vector.extract_strided_slice %102 {offsets = [0, 0], sizes = [2, 32], strides = [1, 1]} : vector<2x128xf32> to vector<2x32xf32>
    %104 = arith.negf %103 : vector<2x32xf32>
    %105 = math.exp %104 : vector<2x32xf32>
    %cst_25 = arith.constant 1.000000e+00 : f32
    %106 = vector.broadcast %cst_25 : f32 to vector<2x32xf32>
    %107 = arith.addf %106, %105 : vector<2x32xf32>
    %108 = arith.divf %106, %107 : vector<2x32xf32>
    %109 = vector.extract_strided_slice %102 {offsets = [0, 32], sizes = [2, 32], strides = [1, 1]} : vector<2x128xf32> to vector<2x32xf32>
    %110 = arith.negf %109 : vector<2x32xf32>
    %111 = math.exp %110 : vector<2x32xf32>
    %cst_26 = arith.constant 1.000000e+00 : f32
    %112 = vector.broadcast %cst_26 : f32 to vector<2x32xf32>
    %113 = arith.addf %112, %111 : vector<2x32xf32>
    %114 = arith.divf %112, %113 : vector<2x32xf32>
    %115 = vector.extract_strided_slice %102 {offsets = [0, 64], sizes = [2, 32], strides = [1, 1]} : vector<2x128xf32> to vector<2x32xf32>
    %116 = math.tanh %115 : vector<2x32xf32>
    %117 = vector.extract_strided_slice %102 {offsets = [0, 96], sizes = [2, 32], strides = [1, 1]} : vector<2x128xf32> to vector<2x32xf32>
    %118 = arith.negf %117 : vector<2x32xf32>
    %119 = math.exp %118 : vector<2x32xf32>
    %cst_27 = arith.constant 1.000000e+00 : f32
    %120 = vector.broadcast %cst_27 : f32 to vector<2x32xf32>
    %121 = arith.addf %120, %119 : vector<2x32xf32>
    %122 = arith.divf %120, %121 : vector<2x32xf32>
    %123 = arith.mulf %114, %97 : vector<2x32xf32>
    %124 = arith.mulf %108, %116 : vector<2x32xf32>
    %125 = arith.addf %123, %124 : vector<2x32xf32>
    %126 = math.tanh %125 : vector<2x32xf32>
    %127 = arith.mulf %122, %126 : vector<2x32xf32>
    %128 = vector.extract_strided_slice %12 {offsets = [8, 0], sizes = [2, 128], strides = [1, 1]} : vector<16x128xf32> to vector<2x128xf32>
    %cst_28 = arith.constant dense<0.000000e+00> : vector<2x128xf32>
    %129 = tpu.matmul %127, %13, %cst_28 {dimension_numbers = #tpu.dot_dimension_numbers<[1], [0], [0], [1], [0, 0, 1, 1], [], []>} : vector<2x32xf32>, vector<32x128xf32>, vector<2x128xf32> -> vector<2x128xf32>
    %130 = arith.addf %128, %129 : vector<2x128xf32>
    %131 = vector.extract_strided_slice %130 {offsets = [0, 0], sizes = [2, 32], strides = [1, 1]} : vector<2x128xf32> to vector<2x32xf32>
    %132 = arith.negf %131 : vector<2x32xf32>
    %133 = math.exp %132 : vector<2x32xf32>
    %cst_29 = arith.constant 1.000000e+00 : f32
    %134 = vector.broadcast %cst_29 : f32 to vector<2x32xf32>
    %135 = arith.addf %134, %133 : vector<2x32xf32>
    %136 = arith.divf %134, %135 : vector<2x32xf32>
    %137 = vector.extract_strided_slice %130 {offsets = [0, 32], sizes = [2, 32], strides = [1, 1]} : vector<2x128xf32> to vector<2x32xf32>
    %138 = arith.negf %137 : vector<2x32xf32>
    %139 = math.exp %138 : vector<2x32xf32>
    %cst_30 = arith.constant 1.000000e+00 : f32
    %140 = vector.broadcast %cst_30 : f32 to vector<2x32xf32>
    %141 = arith.addf %140, %139 : vector<2x32xf32>
    %142 = arith.divf %140, %141 : vector<2x32xf32>
    %143 = vector.extract_strided_slice %130 {offsets = [0, 64], sizes = [2, 32], strides = [1, 1]} : vector<2x128xf32> to vector<2x32xf32>
    %144 = math.tanh %143 : vector<2x32xf32>
    %145 = vector.extract_strided_slice %130 {offsets = [0, 96], sizes = [2, 32], strides = [1, 1]} : vector<2x128xf32> to vector<2x32xf32>
    %146 = arith.negf %145 : vector<2x32xf32>
    %147 = math.exp %146 : vector<2x32xf32>
    %cst_31 = arith.constant 1.000000e+00 : f32
    %148 = vector.broadcast %cst_31 : f32 to vector<2x32xf32>
    %149 = arith.addf %148, %147 : vector<2x32xf32>
    %150 = arith.divf %148, %149 : vector<2x32xf32>
    %151 = arith.mulf %142, %125 : vector<2x32xf32>
    %152 = arith.mulf %136, %144 : vector<2x32xf32>
    %153 = arith.addf %151, %152 : vector<2x32xf32>
    %154 = math.tanh %153 : vector<2x32xf32>
    %155 = arith.mulf %150, %154 : vector<2x32xf32>
    %156 = vector.extract_strided_slice %12 {offsets = [10, 0], sizes = [2, 128], strides = [1, 1]} : vector<16x128xf32> to vector<2x128xf32>
    %cst_32 = arith.constant dense<0.000000e+00> : vector<2x128xf32>
    %157 = tpu.matmul %155, %13, %cst_32 {dimension_numbers = #tpu.dot_dimension_numbers<[1], [0], [0], [1], [0, 0, 1, 1], [], []>} : vector<2x32xf32>, vector<32x128xf32>, vector<2x128xf32> -> vector<2x128xf32>
    %158 = arith.addf %156, %157 : vector<2x128xf32>
    %159 = vector.extract_strided_slice %158 {offsets = [0, 0], sizes = [2, 32], strides = [1, 1]} : vector<2x128xf32> to vector<2x32xf32>
    %160 = arith.negf %159 : vector<2x32xf32>
    %161 = math.exp %160 : vector<2x32xf32>
    %cst_33 = arith.constant 1.000000e+00 : f32
    %162 = vector.broadcast %cst_33 : f32 to vector<2x32xf32>
    %163 = arith.addf %162, %161 : vector<2x32xf32>
    %164 = arith.divf %162, %163 : vector<2x32xf32>
    %165 = vector.extract_strided_slice %158 {offsets = [0, 32], sizes = [2, 32], strides = [1, 1]} : vector<2x128xf32> to vector<2x32xf32>
    %166 = arith.negf %165 : vector<2x32xf32>
    %167 = math.exp %166 : vector<2x32xf32>
    %cst_34 = arith.constant 1.000000e+00 : f32
    %168 = vector.broadcast %cst_34 : f32 to vector<2x32xf32>
    %169 = arith.addf %168, %167 : vector<2x32xf32>
    %170 = arith.divf %168, %169 : vector<2x32xf32>
    %171 = vector.extract_strided_slice %158 {offsets = [0, 64], sizes = [2, 32], strides = [1, 1]} : vector<2x128xf32> to vector<2x32xf32>
    %172 = math.tanh %171 : vector<2x32xf32>
    %173 = vector.extract_strided_slice %158 {offsets = [0, 96], sizes = [2, 32], strides = [1, 1]} : vector<2x128xf32> to vector<2x32xf32>
    %174 = arith.negf %173 : vector<2x32xf32>
    %175 = math.exp %174 : vector<2x32xf32>
    %cst_35 = arith.constant 1.000000e+00 : f32
    %176 = vector.broadcast %cst_35 : f32 to vector<2x32xf32>
    %177 = arith.addf %176, %175 : vector<2x32xf32>
    %178 = arith.divf %176, %177 : vector<2x32xf32>
    %179 = arith.mulf %170, %153 : vector<2x32xf32>
    %180 = arith.mulf %164, %172 : vector<2x32xf32>
    %181 = arith.addf %179, %180 : vector<2x32xf32>
    %182 = math.tanh %181 : vector<2x32xf32>
    %183 = arith.mulf %178, %182 : vector<2x32xf32>
    %184 = vector.extract_strided_slice %12 {offsets = [12, 0], sizes = [2, 128], strides = [1, 1]} : vector<16x128xf32> to vector<2x128xf32>
    %cst_36 = arith.constant dense<0.000000e+00> : vector<2x128xf32>
    %185 = tpu.matmul %183, %13, %cst_36 {dimension_numbers = #tpu.dot_dimension_numbers<[1], [0], [0], [1], [0, 0, 1, 1], [], []>} : vector<2x32xf32>, vector<32x128xf32>, vector<2x128xf32> -> vector<2x128xf32>
    %186 = arith.addf %184, %185 : vector<2x128xf32>
    %187 = vector.extract_strided_slice %186 {offsets = [0, 0], sizes = [2, 32], strides = [1, 1]} : vector<2x128xf32> to vector<2x32xf32>
    %188 = arith.negf %187 : vector<2x32xf32>
    %189 = math.exp %188 : vector<2x32xf32>
    %cst_37 = arith.constant 1.000000e+00 : f32
    %190 = vector.broadcast %cst_37 : f32 to vector<2x32xf32>
    %191 = arith.addf %190, %189 : vector<2x32xf32>
    %192 = arith.divf %190, %191 : vector<2x32xf32>
    %193 = vector.extract_strided_slice %186 {offsets = [0, 32], sizes = [2, 32], strides = [1, 1]} : vector<2x128xf32> to vector<2x32xf32>
    %194 = arith.negf %193 : vector<2x32xf32>
    %195 = math.exp %194 : vector<2x32xf32>
    %cst_38 = arith.constant 1.000000e+00 : f32
    %196 = vector.broadcast %cst_38 : f32 to vector<2x32xf32>
    %197 = arith.addf %196, %195 : vector<2x32xf32>
    %198 = arith.divf %196, %197 : vector<2x32xf32>
    %199 = vector.extract_strided_slice %186 {offsets = [0, 64], sizes = [2, 32], strides = [1, 1]} : vector<2x128xf32> to vector<2x32xf32>
    %200 = math.tanh %199 : vector<2x32xf32>
    %201 = vector.extract_strided_slice %186 {offsets = [0, 96], sizes = [2, 32], strides = [1, 1]} : vector<2x128xf32> to vector<2x32xf32>
    %202 = arith.negf %201 : vector<2x32xf32>
    %203 = math.exp %202 : vector<2x32xf32>
    %cst_39 = arith.constant 1.000000e+00 : f32
    %204 = vector.broadcast %cst_39 : f32 to vector<2x32xf32>
    %205 = arith.addf %204, %203 : vector<2x32xf32>
    %206 = arith.divf %204, %205 : vector<2x32xf32>
    %207 = arith.mulf %198, %181 : vector<2x32xf32>
    %208 = arith.mulf %192, %200 : vector<2x32xf32>
    %209 = arith.addf %207, %208 : vector<2x32xf32>
    %210 = math.tanh %209 : vector<2x32xf32>
    %211 = arith.mulf %206, %210 : vector<2x32xf32>
    %212 = vector.extract_strided_slice %12 {offsets = [14, 0], sizes = [2, 128], strides = [1, 1]} : vector<16x128xf32> to vector<2x128xf32>
    %cst_40 = arith.constant dense<0.000000e+00> : vector<2x128xf32>
    %213 = tpu.matmul %211, %13, %cst_40 {dimension_numbers = #tpu.dot_dimension_numbers<[1], [0], [0], [1], [0, 0, 1, 1], [], []>} : vector<2x32xf32>, vector<32x128xf32>, vector<2x128xf32> -> vector<2x128xf32>
    %214 = arith.addf %212, %213 : vector<2x128xf32>
    %215 = vector.extract_strided_slice %214 {offsets = [0, 0], sizes = [2, 32], strides = [1, 1]} : vector<2x128xf32> to vector<2x32xf32>
    %216 = arith.negf %215 : vector<2x32xf32>
    %217 = math.exp %216 : vector<2x32xf32>
    %cst_41 = arith.constant 1.000000e+00 : f32
    %218 = vector.broadcast %cst_41 : f32 to vector<2x32xf32>
    %219 = arith.addf %218, %217 : vector<2x32xf32>
    %220 = arith.divf %218, %219 : vector<2x32xf32>
    %221 = vector.extract_strided_slice %214 {offsets = [0, 32], sizes = [2, 32], strides = [1, 1]} : vector<2x128xf32> to vector<2x32xf32>
    %222 = arith.negf %221 : vector<2x32xf32>
    %223 = math.exp %222 : vector<2x32xf32>
    %cst_42 = arith.constant 1.000000e+00 : f32
    %224 = vector.broadcast %cst_42 : f32 to vector<2x32xf32>
    %225 = arith.addf %224, %223 : vector<2x32xf32>
    %226 = arith.divf %224, %225 : vector<2x32xf32>
    %227 = vector.extract_strided_slice %214 {offsets = [0, 64], sizes = [2, 32], strides = [1, 1]} : vector<2x128xf32> to vector<2x32xf32>
    %228 = math.tanh %227 : vector<2x32xf32>
    %229 = vector.extract_strided_slice %214 {offsets = [0, 96], sizes = [2, 32], strides = [1, 1]} : vector<2x128xf32> to vector<2x32xf32>
    %230 = arith.negf %229 : vector<2x32xf32>
    %231 = math.exp %230 : vector<2x32xf32>
    %cst_43 = arith.constant 1.000000e+00 : f32
    %232 = vector.broadcast %cst_43 : f32 to vector<2x32xf32>
    %233 = arith.addf %232, %231 : vector<2x32xf32>
    %234 = arith.divf %232, %233 : vector<2x32xf32>
    %235 = arith.mulf %226, %209 : vector<2x32xf32>
    %236 = arith.mulf %220, %228 : vector<2x32xf32>
    %237 = arith.addf %235, %236 : vector<2x32xf32>
    %238 = math.tanh %237 : vector<2x32xf32>
    %239 = arith.mulf %234, %238 : vector<2x32xf32>
    %240 = tpu.concatenate %43, %71, %99, %127, %155, %183, %211, %239 in 0 : vector<2x32xf32>, vector<2x32xf32>, vector<2x32xf32>, vector<2x32xf32>, vector<2x32xf32>, vector<2x32xf32>, vector<2x32xf32>, vector<2x32xf32> -> vector<16x32xf32>
    %c0_44 = arith.constant 0 : index
    %c0_45 = arith.constant 0 : index
    %241 = vector.load %arg8[%c0_44, %c0_45] : memref<32x10xf32, #tpu.memory_space<vmem>>, vector<32x10xf32>
    %cst_46 = arith.constant dense<0.000000e+00> : vector<2x10xf32>
    %242 = tpu.matmul %239, %241, %cst_46 {dimension_numbers = #tpu.dot_dimension_numbers<[1], [0], [0], [1], [0, 0, 1, 1], [], []>} : vector<2x32xf32>, vector<32x10xf32>, vector<2x10xf32> -> vector<2x10xf32>
    %c0_47 = arith.constant 0 : index
    %c0_48 = arith.constant 0 : index
    %243 = vector.load %arg9[%c0_47, %c0_48] : memref<1x10xf32, #tpu.memory_space<vmem>>, vector<1x10xf32>
    %244 = vector.broadcast %243 : vector<1x10xf32> to vector<2x10xf32>
    %245 = arith.addf %242, %244 : vector<2x10xf32>
    %cst_49 = arith.constant dense<0xFF800000> : vector<2xf32>
    %246 = vector.multi_reduction <maximumf>, %245, %cst_49 [1] : vector<2x10xf32> to vector<2xf32>
    %247 = vector.shape_cast %246 : vector<2xf32> to vector<2x1xf32>
    %248 = vector.broadcast %247 : vector<2x1xf32> to vector<2x10xf32>
    %249 = arith.subf %245, %248 : vector<2x10xf32>
    %250 = math.exp %249 : vector<2x10xf32>
    %cst_50 = arith.constant dense<0.000000e+00> : vector<2xf32>
    %251 = vector.multi_reduction <add>, %250, %cst_50 [1] : vector<2x10xf32> to vector<2xf32>
    %252 = vector.shape_cast %251 : vector<2xf32> to vector<2x1xf32>
    %253 = vector.broadcast %252 : vector<2x1xf32> to vector<2x10xf32>
    %254 = arith.divf %250, %253 : vector<2x10xf32>
    %c0_51 = arith.constant 0 : index
    %c0_52 = arith.constant 0 : index
    %255 = vector.load %arg12[%c0_51, %c0_52] : memref<2x10xf32, #tpu.memory_space<vmem>>, vector<2x10xf32>
    tpu.vector_store %arg12[%c0_51, %c0_52], %254 {strides = array<i32>} : memref<2x10xf32, #tpu.memory_space<vmem>>, vector<2x10xf32>,
    %c0_53 = arith.constant 0 : index
    %c0_54 = arith.constant 0 : index
    %256 = vector.load %arg6[%c0_53, %c0_54] : memref<32x270xf32, #tpu.memory_space<vmem>>, vector<32x270xf32>
    %cst_55 = arith.constant dense<0.000000e+00> : vector<16x270xf32>
    %257 = tpu.matmul %240, %256, %cst_55 {dimension_numbers = #tpu.dot_dimension_numbers<[1], [0], [0], [1], [0, 0, 1, 1], [], []>} : vector<16x32xf32>, vector<32x270xf32>, vector<16x270xf32> -> vector<16x270xf32>
    %c0_56 = arith.constant 0 : index
    %c0_57 = arith.constant 0 : index
    %258 = vector.load %arg7[%c0_56, %c0_57] : memref<1x270xf32, #tpu.memory_space<vmem>>, vector<1x270xf32>
    %259 = vector.broadcast %258 : vector<1x270xf32> to vector<16x270xf32>
    %260 = arith.addf %257, %259 : vector<16x270xf32>
    %c0_58 = arith.constant 0 : index
    %c0_59 = arith.constant 0 : index
    %261 = vector.load %arg10[%c0_58, %c0_59] : memref<16x270xf32, #tpu.memory_space<vmem>>, vector<16x270xf32>
    tpu.vector_store %arg10[%c0_58, %c0_59], %260 {strides = array<i32>} : memref<16x270xf32, #tpu.memory_space<vmem>>, vector<16x270xf32>,
    %262 = tpu.concatenate %254, %254, %254, %254, %254, %254, %254, %254 in 0 : vector<2x10xf32>, vector<2x10xf32>, vector<2x10xf32>, vector<2x10xf32>, vector<2x10xf32>, vector<2x10xf32>, vector<2x10xf32>, vector<2x10xf32> -> vector<16x10xf32>
    %263 = vector.extract_strided_slice %260 {offsets = [0, 0], sizes = [16, 27], strides = [1, 1]} : vector<16x270xf32> to vector<16x27xf32>
    %264 = vector.extract_strided_slice %262 {offsets = [0, 0], sizes = [16, 1], strides = [1, 1]} : vector<16x10xf32> to vector<16x1xf32>
    %265 = vector.broadcast %264 : vector<16x1xf32> to vector<16x27xf32>
    %266 = arith.mulf %263, %265 : vector<16x27xf32>
    %267 = vector.extract_strided_slice %260 {offsets = [0, 27], sizes = [16, 27], strides = [1, 1]} : vector<16x270xf32> to vector<16x27xf32>
    %268 = vector.extract_strided_slice %262 {offsets = [0, 1], sizes = [16, 1], strides = [1, 1]} : vector<16x10xf32> to vector<16x1xf32>
    %269 = vector.broadcast %268 : vector<16x1xf32> to vector<16x27xf32>
    %270 = arith.mulf %267, %269 : vector<16x27xf32>
    %271 = arith.addf %266, %270 : vector<16x27xf32>
    %272 = vector.extract_strided_slice %260 {offsets = [0, 54], sizes = [16, 27], strides = [1, 1]} : vector<16x270xf32> to vector<16x27xf32>
    %273 = vector.extract_strided_slice %262 {offsets = [0, 2], sizes = [16, 1], strides = [1, 1]} : vector<16x10xf32> to vector<16x1xf32>
    %274 = vector.broadcast %273 : vector<16x1xf32> to vector<16x27xf32>
    %275 = arith.mulf %272, %274 : vector<16x27xf32>
    %276 = arith.addf %271, %275 : vector<16x27xf32>
    %277 = vector.extract_strided_slice %260 {offsets = [0, 81], sizes = [16, 27], strides = [1, 1]} : vector<16x270xf32> to vector<16x27xf32>
    %278 = vector.extract_strided_slice %262 {offsets = [0, 3], sizes = [16, 1], strides = [1, 1]} : vector<16x10xf32> to vector<16x1xf32>
    %279 = vector.broadcast %278 : vector<16x1xf32> to vector<16x27xf32>
    %280 = arith.mulf %277, %279 : vector<16x27xf32>
    %281 = arith.addf %276, %280 : vector<16x27xf32>
    %282 = vector.extract_strided_slice %260 {offsets = [0, 108], sizes = [16, 27], strides = [1, 1]} : vector<16x270xf32> to vector<16x27xf32>
    %283 = vector.extract_strided_slice %262 {offsets = [0, 4], sizes = [16, 1], strides = [1, 1]} : vector<16x10xf32> to vector<16x1xf32>
    %284 = vector.broadcast %283 : vector<16x1xf32> to vector<16x27xf32>
    %285 = arith.mulf %282, %284 : vector<16x27xf32>
    %286 = arith.addf %281, %285 : vector<16x27xf32>
    %287 = vector.extract_strided_slice %260 {offsets = [0, 135], sizes = [16, 27], strides = [1, 1]} : vector<16x270xf32> to vector<16x27xf32>
    %288 = vector.extract_strided_slice %262 {offsets = [0, 5], sizes = [16, 1], strides = [1, 1]} : vector<16x10xf32> to vector<16x1xf32>
    %289 = vector.broadcast %288 : vector<16x1xf32> to vector<16x27xf32>
    %290 = arith.mulf %287, %289 : vector<16x27xf32>
    %291 = arith.addf %286, %290 : vector<16x27xf32>
    %292 = vector.extract_strided_slice %260 {offsets = [0, 162], sizes = [16, 27], strides = [1, 1]} : vector<16x270xf32> to vector<16x27xf32>
    %293 = vector.extract_strided_slice %262 {offsets = [0, 6], sizes = [16, 1], strides = [1, 1]} : vector<16x10xf32> to vector<16x1xf32>
    %294 = vector.broadcast %293 : vector<16x1xf32> to vector<16x27xf32>
    %295 = arith.mulf %292, %294 : vector<16x27xf32>
    %296 = arith.addf %291, %295 : vector<16x27xf32>
    %297 = vector.extract_strided_slice %260 {offsets = [0, 189], sizes = [16, 27], strides = [1, 1]} : vector<16x270xf32> to vector<16x27xf32>
    %298 = vector.extract_strided_slice %262 {offsets = [0, 7], sizes = [16, 1], strides = [1, 1]} : vector<16x10xf32> to vector<16x1xf32>
    %299 = vector.broadcast %298 : vector<16x1xf32> to vector<16x27xf32>
    %300 = arith.mulf %297, %299 : vector<16x27xf32>
    %301 = arith.addf %296, %300 : vector<16x27xf32>
    %302 = vector.extract_strided_slice %260 {offsets = [0, 216], sizes = [16, 27], strides = [1, 1]} : vector<16x270xf32> to vector<16x27xf32>
    %303 = vector.extract_strided_slice %262 {offsets = [0, 8], sizes = [16, 1], strides = [1, 1]} : vector<16x10xf32> to vector<16x1xf32>
    %304 = vector.broadcast %303 : vector<16x1xf32> to vector<16x27xf32>
    %305 = arith.mulf %302, %304 : vector<16x27xf32>
    %306 = arith.addf %301, %305 : vector<16x27xf32>
    %307 = vector.extract_strided_slice %260 {offsets = [0, 243], sizes = [16, 27], strides = [1, 1]} : vector<16x270xf32> to vector<16x27xf32>
    %308 = vector.extract_strided_slice %262 {offsets = [0, 9], sizes = [16, 1], strides = [1, 1]} : vector<16x10xf32> to vector<16x1xf32>
    %309 = vector.broadcast %308 : vector<16x1xf32> to vector<16x27xf32>
    %310 = arith.mulf %307, %309 : vector<16x27xf32>
    %311 = arith.addf %306, %310 : vector<16x27xf32>
    %c0_60 = arith.constant 0 : index
    %c0_61 = arith.constant 0 : index
    %312 = vector.load %arg11[%c0_60, %c0_61] : memref<16x27xf32, #tpu.memory_space<vmem>>, vector<16x27xf32>
    tpu.vector_store %arg11[%c0_60, %c0_61], %311 {strides = array<i32>} : memref<16x27xf32, #tpu.memory_space<vmem>>, vector<16x27xf32>,
    return
  }
  func.func @transform_0(%arg0: i32) -> (i32, i32) {
    %c0_i32 = arith.constant 0 : i32
    %c0_i32_0 = arith.constant 0 : i32
    %c0_i32_1 = arith.constant 0 : i32
    return %c0_i32, %c0_i32_0 : i32, i32
  }
  func.func @transform_1(%arg0: i32) -> (i32, i32) {
    %c0_i32 = arith.constant 0 : i32
    %c0_i32_0 = arith.constant 0 : i32
    %c0_i32_1 = arith.constant 0 : i32
    return %c0_i32, %c0_i32_0 : i32, i32
  }
  func.func @transform_2(%arg0: i32) -> (i32, i32) {
    %c0_i32 = arith.constant 0 : i32
    %c0_i32_0 = arith.constant 0 : i32
    %c0_i32_1 = arith.constant 0 : i32
    return %c0_i32, %c0_i32_0 : i32, i32
  }
  func.func @transform_3(%arg0: i32) -> (i32, i32) {
    %c0_i32 = arith.constant 0 : i32
    %c0_i32_0 = arith.constant 0 : i32
    %c0_i32_1 = arith.constant 0 : i32
    return %c0_i32, %c0_i32_0 : i32, i32
  }
  func.func @transform_4(%arg0: i32) -> (i32, i32) {
    %c0_i32 = arith.constant 0 : i32
    %c0_i32_0 = arith.constant 0 : i32
    %c0_i32_1 = arith.constant 0 : i32
    return %c0_i32, %c0_i32_0 : i32, i32
  }
  func.func @transform_5(%arg0: i32) -> (i32, i32) {
    %c0_i32 = arith.constant 0 : i32
    %c0_i32_0 = arith.constant 0 : i32
    %c0_i32_1 = arith.constant 0 : i32
    return %c0_i32, %c0_i32_0 : i32, i32
  }
  func.func @transform_6(%arg0: i32) -> (i32, i32) {
    %c0_i32 = arith.constant 0 : i32
    %c0_i32_0 = arith.constant 0 : i32
    %c0_i32_1 = arith.constant 0 : i32
    return %c0_i32, %c0_i32_0 : i32, i32
  }
  func.func @transform_7(%arg0: i32) -> (i32, i32) {
    %c0_i32 = arith.constant 0 : i32
    %c0_i32_0 = arith.constant 0 : i32
    %c0_i32_1 = arith.constant 0 : i32
    return %c0_i32, %c0_i32_0 : i32, i32
  }
  func.func @transform_8(%arg0: i32) -> (i32, i32) {
    %c0_i32 = arith.constant 0 : i32
    %c0_i32_0 = arith.constant 0 : i32
    %c0_i32_1 = arith.constant 0 : i32
    return %c0_i32, %c0_i32_0 : i32, i32
  }
  func.func @transform_9(%arg0: i32) -> (i32, i32) {
    %c0_i32 = arith.constant 0 : i32
    %c0_i32_0 = arith.constant 0 : i32
    %c0_i32_1 = arith.constant 0 : i32
    return %c0_i32, %c0_i32_0 : i32, i32
  }
  func.func @transform_10(%arg0: i32) -> (i32, i32) {
    %c0_i32 = arith.constant 0 : i32
    %c0_i32_0 = arith.constant 0 : i32
    %c0_i32_1 = arith.constant 0 : i32
    return %c0_i32, %c0_i32_0 : i32, i32
  }
  func.func @transform_11(%arg0: i32) -> (i32, i32) {
    %c0_i32 = arith.constant 0 : i32
    %c0_i32_0 = arith.constant 0 : i32
    %c0_i32_1 = arith.constant 0 : i32
    return %c0_i32, %c0_i32_0 : i32, i32
  }
}

</mosaic_0001>

<bundles_post_ra>
// kernel: moe_module_forward.1
= control target key start
LH: loop header
LB: loop body
LE: loop exit
PB: predicated region body
PF: predicated region fallthrough
CT: control target
= control target key end

     0   :  { %vm63_vm0 = vcmask 1042432   ;;  %v1222_v3 = vmov 0   ;;  %s1620_s0 = inlined_call_operand.vmem [shape: s32[16,1], index: 0, kind: input, shape index: {}]   ;;  %s1621_s1 = inlined_call_operand.vmem [shape: f32[27,16], index: 1, kind: input, shape index: {}]   ;;  %s1622_s2 = inlined_call_operand.vmem [shape: f32[16,128], index: 2, kind: input, shape index: {}]   ;;  %s1623_s3 = inlined_call_operand.vmem [shape: f32[32,128], index: 3, kind: input, shape index: {}]   ;;  %s1624_s4 = inlined_call_operand.vmem [shape: f32[1,128], index: 4, kind: input, shape index: {}]   ;;  %s1625_s5 = inlined_call_operand.vmem [shape: f32[32,270], index: 5, kind: input, shape index: {}]   ;;  %s1626_s6 = inlined_call_operand.vmem [shape: f32[1,270], index: 6, kind: input, shape index: {}]   ;;  %s1627_s7 = inlined_call_operand.vmem [shape: f32[32,10], index: 7, kind: input, shape index: {}]   ;;  %s1628_s8 = inlined_call_operand.vmem [shape: f32[1,10], index: 8, kind: input, shape index: {}]   ;;  %s1629_s9 = inlined_call_operand.vmem [shape: f32[16,270], index: 9, kind: output, shape index: {0}]   ;;  %s1630_s10 = inlined_call_operand.vmem [shape: f32[16,27], index: 10, kind: output, shape index: {1}]   ;;  %s1631_s11 = inlined_call_operand.hbm [shape: f32[2,10], index: 11, kind: output, shape index: {2}]  }
   0x1   :  { %v36_v0 = vld [vmem:[%s1620_s0] sm:$0xff]  ;;  %v55_v1 = vld [vmem:[%s1621_s1 + $0x18] sm:$0x7]  ;;  %v54_v2 = vld [vmem:[%s1621_s1 + $0x10] sm:$0xff]  ;;  %1113 = vset.pattern.permute.xlu0 %v1222_v3  ;;  %1114 = vset.pattern.permute.xlu1 %v1222_v3 }
   0x2   :  { %1063 = vmatpush.msk.msra.mxu0 %vm63_vm0, %v55_v1  ;;  %41 = vperm.xlu0 %1113, %v36_v0   ;;  %v53_v4 = vld [vmem:[%s1621_s1 + $0x8] sm:$0xff] }
   0x3   :  { %17 = vsyncpa [#allocation3], 0  ;;  %1115 = vset.pattern.permute.xlu2 %v1222_v3  ;;  %v52_v5 = vld [vmem:[%s1621_s1] sm:$0xff]  ;;  %v1323_v6 = vld [vmem:[%s1623_s3 + $0x18] sm:$0xff]  ;;  %v1223_v11 = vmov 0.0   ;;  %v38_v12 = vlaneseq  ;;  %vm56_vm1 = vcmask 220160  }
   0x4   :  { %80 = vmatpush.msra.mxu0 %v54_v2  ;;  %v1328_v7 = vld [vmem:[%s1623_s3 + $0x10] sm:$0xff]  ;;  %146 = vmatpush.msra.mxu2 %v1323_v6  ;;  %v91_v8 = vld [vmem:[%s1622_s2 + $0x8] sm:$0xff]  ;;  %v1345_v10 = vld [vmem:[%s1623_s3] sm:$0xff]  ;;  %vm96_vm3 = vcmask 130048   ;;  %s1224_s19 = smov 64   ;;  %vm130_vm8 = vcmask 261120  }
   0x5   :  { %209 = vmatpush.msra.mxu3 %v1323_v6  ;;  %v1338_v9 = vld [vmem:[%s1623_s3 + $0x8] sm:$0xff]  ;;  %117 = vmatpush.msra.mxu1 %v91_v8  ;;  %v1364_v13 = vand.u32 127, %v38_v12  ;;  %v90_v16 = vld [vmem:[%s1622_s2] sm:$0xff]  ;;  %s1237_s21 = smov 47   ;;  %s1239_s22 = smov 121  }
   0x6   :  { %81 = vmatpush.msra.mxu0 %v53_v4  ;;  %147 = vmatpush.msra.mxu2 %v1328_v7  ;;  %v1384_v18 = vld [vmem:[%s1624_s4] ss:$0 sm:$0xff]  ;;  %s1225_s4 = smov 32   ;;  %s1241_s23 = smov 67  }
   0x7   :  { %210 = vmatpush.msra.mxu3 %v1328_v7  ;;  %118 = vmatpush.msra.mxu1 %v90_v16  ;;  %s1048_s25 = sshll.u32 %s1631_s11, 4  ;;  %s1243_s26 = smov 40   ;;  %s1049_s25 = int_to_ptr.hbm [resolvable:$true] %s1048_s25 }
   0x8   :  { %82 = vmatpush.msra.mxu0 %v52_v5  ;;  %148 = vmatpush.msra.mxu2 %v1338_v9  ;;  %s1244_s27 = smov 13  }
   0x9   :  { %211 = vmatpush.msra.mxu3 %v1338_v9  ;;  %419 = vmatpush.msrb.mxu1 %v1323_v6 }
   0xa   :  { %149 = vmatpush.msra.mxu2 %v1345_v10 }
   0xb   :  { %212 = vmatpush.msra.mxu3 %v1345_v10  ;;  %150 = vmatmul.f32.vlgmr.msra.gmra.mxu2 %v1223_v11 }
   0xc   :  { %279 = vmatpush.msrb.mxu2 %v1323_v6  ;;  %420 = vmatpush.msrb.mxu1 %v1328_v7 }
   0xd   :  { %349 = vmatpush.msrb.mxu3 %v1323_v6 }
   0xe   :  { %280 = vmatpush.msrb.mxu2 %v1328_v7  ;;  %421 = vmatpush.msrb.mxu1 %v1338_v9 }
   0xf   :  { %350 = vmatpush.msrb.mxu3 %v1328_v7 }
  0x10   :  { %281 = vmatpush.msrb.mxu2 %v1338_v9  ;;  %422 = vmatpush.msrb.mxu1 %v1345_v10 }
  0x11   :  { %351 = vmatpush.msrb.mxu3 %v1338_v9 }
  0x12   :  { %282 = vmatpush.msrb.mxu2 %v1345_v10 }
  0x13   :  { %352 = vmatpush.msrb.mxu3 %v1345_v10 }
  0x14   :  { %555 = vmatpush.msra.mxu2 %v1323_v6 }
  0x16   :  { %556 = vmatpush.msra.mxu2 %v1328_v7 }
  0x18   :  { %557 = vmatpush.msra.mxu2 %v1338_v9 }
  0x1a   :  { %558 = vmatpush.msra.mxu2 %v1345_v10 }
  0x74   :  { %v42_v14 = vpop.permute.xlu0 %41 }
  0x75   :  { %vm46_vm2 = vcmp.eq.s32.totalorder %v42_v14, %v1364_v13 }
  0x76   :  { %v1061_v15 = vsel %vm46_vm2, 1.0, %v1223_v11  ;;  %vm677_vm2 = vcmask 1041408  }
  0x77   :  { %1064 = vmatmul.msk.f32.vlgmr.msra.gmra.mxu0 %vm56_vm1, %v1061_v15 }
  0x8e   :  { %v151_v20 = vpop.f32.mrf.mxu2 }
  0xf4   :  { %v84_v17 = vpop.f32.mrf.mxu0 }
  0xf5   :  { %1066 = vmatmul.msk.f32.vlgmr.msra.gmra.mxu1 %vm96_vm3, %v84_v17 }
  0xf6   :  { %485 = vmatpush.msra.mxu1 %v1323_v6 }
  0xf8   :  { %486 = vmatpush.msra.mxu1 %v1328_v7 }
  0xfa   :  { %487 = vmatpush.msra.mxu1 %v1338_v9 }
  0xfc   :  { %488 = vmatpush.msra.mxu1 %v1345_v10 }
 0x172   :  { %v120_v19 = vpop.f32.mrf.mxu1 }
 0x173   :  { %v1387_v21 = vadd.f32 %v1384_v18, %v120_v19 }
 0x175   :  { %v154_v22 = vadd.f32 %v151_v20, %v1387_v21 }
 0x177   :  { %1128 = vtanh.f32 %v154_v22  ;;  %v1068_v24 = vmul.f32 -1.442695, %v154_v22 }
 0x179   :  { %1130 = vpow2.f32 %v1068_v24 }
 0x17d   :  { %v1129_v23 = vpop.eup %1128 }
 0x17e   :  { %177 = vrot.lane.b32.xlu0 %v1129_v23, %s1224_s19 }
 0x17f   :  { %v1131_v25 = vpop.eup %1130 }
 0x180   :  { %v158_v26 = vadd.f32 1.0, %v1131_v25 }
 0x182   :  { %1132 = vrcp.f32 %v158_v26  ;;  %v170_v32 = vand.u32 2147483648, %v158_v26  ;;  %vm164_vm5 = vweird.f32 %v158_v26  ;;  %v168_v33 = vand.u32 2147483647, %v158_v26 }
 0x184   :  { %v171_v35 = vor.u32 1.1754944e-38, %v170_v32  ;;  %vm169_vm7 = vcmp.eq.f32.partialorder %v168_v33, 8.507059e+37 }
 0x188   :  { %v1133_v27 = vpop.eup %1132 }
 0x189   :  { %v160_v28 = vmul.f32 %v1133_v27, %v158_v26  ;;  %vm165_vm4 = vweird.f32 %v1133_v27 }
 0x18a   :  { %vm166_vm6 = vmor %vm164_vm5, %vm165_vm4  ;;  %vm679_vm4 = vcmask 1043456  }
 0x18b   :  { %v161_v29 = vsub.f32 1.0, %v160_v28 }
 0x18d   :  { %v162_v30 = vmul.f32 %v1133_v27, %v161_v29 }
 0x18f   :  { %v163_v31 = vadd.f32 %v1133_v27, %v162_v30 }
 0x191   :  { %v167_v34 = vsel %vm166_vm6, %v1133_v27, %v163_v31 }
 0x192   :  { %v172_v37 = vsel %vm169_vm7, %v171_v35, %v167_v34 }
 0x193   :  { %v175_v39 = vmul.f32 0.0, %v172_v37 }
 0x1f0   :  { %v178_v36 = vpop.permute.xlu0 %177 }
 0x1f1   :  { %v180_v38 = vmul.f32 %v178_v36, %v172_v37 }
 0x1f3   :  { %182 = vrot.lane.b32.xlu1 %v180_v38, %s1225_s4 }
 0x265   :  { %v183_v40 = vpop.permute.xlu1 %182 }
 0x266   :  { %v185_v41 = vadd.f32 %v183_v40, %v175_v39 }
 0x268   :  { %1134 = vtanh.f32 %v185_v41  ;;  %v242_v1 = vrot.slane %v185_v41, 6 }
 0x26e   :  { %v1135_v42 = vpop.eup %1134 }
 0x26f   :  { %188 = vrot.lane.b32.xlu1 %v1135_v42, %s1224_s19 }
 0x2e1   :  { %v189_v43 = vpop.permute.xlu1 %188 }
 0x2e2   :  { %v1393_v44 = vmul.f32 %v189_v43, %v172_v37 }
 0x2e4   :  { %193 = vrot.lane.b32.xlu2 %v1393_v44, %s1225_s4 }
 0x33e   :  { %v194_v45 = vpop.permute.xlu2 %193 }
 0x33f   :  { %1069 = vmatmul.msk.f32.vlgmr.msra.gmra.mxu3 %vm130_vm8, %v194_v45 }
 0x340   :  { %625 = vmatpush.msra.mxu3 %v1323_v6 }
 0x342   :  { %626 = vmatpush.msra.mxu3 %v1328_v7 }
 0x344   :  { %627 = vmatpush.msra.mxu3 %v1338_v9 }
 0x346   :  { %628 = vmatpush.msra.mxu3 %v1345_v10 }
 0x3c2   :  { %v214_v46 = vpop.f32.mrf.mxu3 }
 0x3c3   :  { %v218_v47 = vrot.slane %v214_v46, 6 }
 0x3c5   :  { %v220_v48 = vadd.f32 %v218_v47, %v1387_v21 }
 0x3c7   :  { %1136 = vtanh.f32 %v220_v48  ;;  %v1070_v50 = vmul.f32 -1.442695, %v220_v48 }
 0x3c9   :  { %1138 = vpow2.f32 %v1070_v50 }
 0x3cd   :  { %v1137_v49 = vpop.eup %1136 }
 0x3ce   :  { %246 = vrot.lane.b32.xlu2 %v1137_v49, %s1224_s19 }
 0x3cf   :  { %v1139_v51 = vpop.eup %1138 }
 0x3d0   :  { %v224_v52 = vadd.f32 1.0, %v1139_v51  ;;  %v37_v51 = vld [vmem:[%s1620_s0 + $0x8] sm:$0xff]  ;;  %s1238_s0 = smov 20  }
 0x3d2   :  { %1140 = vrcp.f32 %v224_v52  ;;  %v236_v58 = vand.u32 2147483648, %v224_v52  ;;  %vm230_vm10 = vweird.f32 %v224_v52  ;;  %v234_v59 = vand.u32 2147483647, %v224_v52 }
 0x3d4   :  { %v237_v61 = vor.u32 1.1754944e-38, %v236_v58  ;;  %vm235_vm12 = vcmp.eq.f32.partialorder %v234_v59, 8.507059e+37 }
 0x3d8   :  { %v1141_v53 = vpop.eup %1140 }
 0x3d9   :  { %v226_v54 = vmul.f32 %v1141_v53, %v224_v52  ;;  %vm231_vm9 = vweird.f32 %v1141_v53 }
 0x3da   :  { %vm232_vm11 = vmor %vm230_vm10, %vm231_vm9 }
 0x3db   :  { %v227_v55 = vsub.f32 1.0, %v226_v54 }
 0x3dd   :  { %v228_v56 = vmul.f32 %v1141_v53, %v227_v55 }
 0x3df   :  { %v229_v57 = vadd.f32 %v1141_v53, %v228_v56 }
 0x3e1   :  { %v233_v60 = vsel %vm232_vm11, %v1141_v53, %v229_v57  ;;  %vm681_vm11 = vcmask 1045504  }
 0x3e2   :  { %v238_v63 = vsel %vm235_vm12, %v237_v61, %v233_v60 }
 0x3e3   :  { %v244_v2 = vmul.f32 %v242_v1, %v238_v63 }
 0x428   :  { %v247_v62 = vpop.permute.xlu2 %246 }
 0x429   :  { %v249_v0 = vmul.f32 %v247_v62, %v238_v63 }
 0x42b   :  { %251 = vrot.lane.b32.xlu0 %v249_v0, %s1225_s4 }
 0x49d   :  { %v252_v3 = vpop.permute.xlu0 %251 }
 0x49e   :  { %v254_v4 = vadd.f32 %v252_v3, %v244_v2 }
 0x4a0   :  { %1142 = vtanh.f32 %v254_v4  ;;  %v312_v33 = vrot.slane %v254_v4, 6 }
 0x4a6   :  { %v1143_v5 = vpop.eup %1142 }
 0x4a7   :  { %257 = vrot.lane.b32.xlu1 %v1143_v5, %s1224_s19 }
 0x519   :  { %v258_v6 = vpop.permute.xlu1 %257 }
 0x51a   :  { %v260_v7 = vmul.f32 %v258_v6, %v238_v63 }
 0x51c   :  { %v262_v8 = vrot.slane %v260_v7, 2  ;;  %v678_v40 = vsel %vm677_vm2, %v1393_v44, %v260_v7 }
 0x51e   :  { %263 = vrot.lane.b32.xlu2 %v262_v8, %s1225_s4 }
 0x578   :  { %v264_v9 = vpop.permute.xlu2 %263 }
 0x579   :  { %1071 = vmatmul.msk.f32.vlgmr.msrb.gmra.mxu2 %vm130_vm8, %v264_v9 }
 0x5fc   :  { %v284_v10 = vpop.f32.mrf.mxu2 }
 0x5fd   :  { %v288_v12 = vrot.slane %v284_v10, 4 }
 0x5ff   :  { %v290_v14 = vadd.f32 %v288_v12, %v1387_v21 }
 0x601   :  { %1144 = vtanh.f32 %v290_v14  ;;  %v1072_v16 = vmul.f32 -1.442695, %v290_v14 }
 0x603   :  { %1146 = vpow2.f32 %v1072_v16 }
 0x607   :  { %v1145_v15 = vpop.eup %1144 }
 0x608   :  { %316 = vrot.lane.b32.xlu0 %v1145_v15, %s1224_s19 }
 0x609   :  { %v1147_v17 = vpop.eup %1146 }
 0x60a   :  { %v294_v19 = vadd.f32 1.0, %v1147_v17 }
 0x60c   :  { %1148 = vrcp.f32 %v294_v19  ;;  %v306_v26 = vand.u32 2147483648, %v294_v19  ;;  %vm300_vm14 = vweird.f32 %v294_v19  ;;  %v304_v27 = vand.u32 2147483647, %v294_v19 }
 0x60e   :  { %v307_v29 = vor.u32 1.1754944e-38, %v306_v26  ;;  %vm305_vm0 = vcmp.eq.f32.partialorder %v304_v27, 8.507059e+37 }
 0x612   :  { %v1149_v20 = vpop.eup %1148 }
 0x613   :  { %v296_v22 = vmul.f32 %v1149_v20, %v294_v19  ;;  %vm301_vm13 = vweird.f32 %v1149_v20 }
 0x614   :  { %vm302_vm15 = vmor %vm300_vm14, %vm301_vm13 }
 0x615   :  { %v297_v23 = vsub.f32 1.0, %v296_v22 }
 0x617   :  { %v298_v24 = vmul.f32 %v1149_v20, %v297_v23 }
 0x619   :  { %v299_v25 = vadd.f32 %v1149_v20, %v298_v24 }
 0x61b   :  { %v303_v28 = vsel %vm302_vm15, %v1149_v20, %v299_v25 }
 0x61c   :  { %v308_v31 = vsel %vm305_vm0, %v307_v29, %v303_v28 }
 0x61d   :  { %v314_v34 = vmul.f32 %v312_v33, %v308_v31 }
 0x67a   :  { %v317_v30 = vpop.permute.xlu0 %316 }
 0x67b   :  { %v319_v32 = vmul.f32 %v317_v30, %v308_v31 }
 0x67d   :  { %321 = vrot.lane.b32.xlu1 %v319_v32, %s1225_s4 }
 0x685   :  { %44 = vperm.xlu1 %1114, %v37_v51  }
 0x6ef   :  { %v322_v35 = vpop.permute.xlu1 %321 }
 0x6f0   :  { %v324_v36 = vadd.f32 %v322_v35, %v314_v34 }
 0x6f2   :  { %1150 = vtanh.f32 %v324_v36  ;;  %v382_v1 = vrot.slane %v324_v36, 6 }
 0x6f7   :  { %v45_v63 = vpop.permute.xlu1 %44 }
 0x6f8   :  { %v1151_v37 = vpop.eup %1150  ;;  %vm47_vm10 = vcmp.eq.s32.totalorder %v45_v63, %v1364_v13 }
 0x6f9   :  { %327 = vrot.lane.b32.xlu2 %v1151_v37, %s1224_s19  ;;  %v1062_v0 = vsel %vm47_vm10, 1.0, %v1223_v11 }
 0x6fa   :  { %1065 = vmatmul.msk.f32.gmra.mxu0 %vm56_vm1, %v1062_v0 }
 0x753   :  { %v328_v38 = vpop.permute.xlu2 %327 }
 0x754   :  { %v330_v39 = vmul.f32 %v328_v38, %v308_v31 }
 0x756   :  { %v332_v41 = vrot.slane %v330_v39, 4  ;;  %v680_v42 = vsel %vm679_vm4, %v678_v40, %v330_v39 }
 0x758   :  { %333 = vrot.lane.b32.xlu0 %v332_v41, %s1225_s4 }
 0x777   :  { %v87_v6 = vpop.f32.mrf.mxu0 }
 0x778   :  { %1067 = vmatmul.msk.f32.gmra.mxu1 %vm96_vm3, %v87_v6 }
 0x7ca   :  { %v334_v43 = vpop.permute.xlu0 %333 }
 0x7cb   :  { %1073 = vmatmul.msk.f32.vlgmr.msrb.gmra.mxu3 %vm130_vm8, %v334_v43 }
 0x7f5   :  { %v123_v10 = vpop.f32.mrf.mxu1 }
 0x7f6   :  { %v1434_v12 = vadd.f32 %v1384_v18, %v123_v10 }
 0x84e   :  { %v354_v45 = vpop.f32.mrf.mxu3 }
 0x84f   :  { %v358_v46 = vrot.slane %v354_v45, 2 }
 0x851   :  { %v360_v47 = vadd.f32 %v358_v46, %v1387_v21 }
 0x853   :  { %1152 = vtanh.f32 %v360_v47  ;;  %v1074_v49 = vmul.f32 -1.442695, %v360_v47 }
 0x855   :  { %1154 = vpow2.f32 %v1074_v49 }
 0x859   :  { %v1153_v48 = vpop.eup %1152 }
 0x85a   :  { %386 = vrot.lane.b32.xlu2 %v1153_v48, %s1224_s19 }
 0x85b   :  { %v1155_v50 = vpop.eup %1154 }
 0x85c   :  { %v364_v44 = vadd.f32 1.0, %v1155_v50 }
 0x85e   :  { %1156 = vrcp.f32 %v364_v44  ;;  %v376_v21 = vand.u32 2147483648, %v364_v44  ;;  %vm370_vm6 = vweird.f32 %v364_v44  ;;  %v374_v57 = vand.u32 2147483647, %v364_v44 }
 0x860   :  { %v377_v59 = vor.u32 1.1754944e-38, %v376_v21  ;;  %vm375_vm9 = vcmp.eq.f32.partialorder %v374_v57, 8.507059e+37 }
 0x864   :  { %v1157_v52 = vpop.eup %1156 }
 0x865   :  { %v366_v53 = vmul.f32 %v1157_v52, %v364_v44  ;;  %vm371_vm5 = vweird.f32 %v1157_v52 }
 0x866   :  { %vm372_vm7 = vmor %vm370_vm6, %vm371_vm5 }
 0x867   :  { %v367_v54 = vsub.f32 1.0, %v366_v53 }
 0x869   :  { %v368_v55 = vmul.f32 %v1157_v52, %v367_v54 }
 0x86b   :  { %v369_v56 = vadd.f32 %v1157_v52, %v368_v55 }
 0x86d   :  { %v373_v58 = vsel %vm372_vm7, %v1157_v52, %v369_v56 }
 0x86e   :  { %v378_v61 = vsel %vm375_vm9, %v377_v59, %v373_v58 }
 0x86f   :  { %v384_v2 = vmul.f32 %v382_v1, %v378_v61 }
 0x8b4   :  { %v387_v60 = vpop.permute.xlu2 %386 }
 0x8b5   :  { %v389_v62 = vmul.f32 %v387_v60, %v378_v61 }
 0x8b7   :  { %391 = vrot.lane.b32.xlu0 %v389_v62, %s1225_s4 }
 0x929   :  { %v392_v3 = vpop.permute.xlu0 %391 }
 0x92a   :  { %v394_v4 = vadd.f32 %v392_v3, %v384_v2 }
 0x92c   :  { %1158 = vtanh.f32 %v394_v4  ;;  %v449_v33 = vrot.slane %v394_v4, 6 }
 0x932   :  { %v1159_v5 = vpop.eup %1158 }
 0x933   :  { %397 = vrot.lane.b32.xlu1 %v1159_v5, %s1224_s19 }
 0x9a5   :  { %v398_v7 = vpop.permute.xlu1 %397 }
 0x9a6   :  { %v400_v8 = vmul.f32 %v398_v7, %v378_v61 }
 0x9a8   :  { %v402_v9 = vrot.slane %v400_v8, 6  ;;  %v1429_v13 = vsel %vm681_vm11, %v680_v42, %v400_v8 }
 0x9aa   :  { %403 = vrot.lane.b32.xlu2 %v402_v9, %s1225_s4 }
 0xa04   :  { %v404_v11 = vpop.permute.xlu2 %403 }
 0xa05   :  { %1075 = vmatmul.msk.f32.vlgmr.msrb.gmra.mxu1 %vm130_vm8, %v404_v11 }
 0xa82   :  { %v424_v14 = vpop.f32.mrf.mxu1 }
 0xa83   :  { %v427_v15 = vadd.f32 %v424_v14, %v1434_v12 }
 0xa85   :  { %1160 = vtanh.f32 %v427_v15  ;;  %v1076_v17 = vmul.f32 -1.442695, %v427_v15 }
 0xa87   :  { %1162 = vpow2.f32 %v1076_v17 }
 0xa8b   :  { %v1161_v16 = vpop.eup %1160 }
 0xa8c   :  { %453 = vrot.lane.b32.xlu0 %v1161_v16, %s1224_s19 }
 0xa8d   :  { %v1163_v19 = vpop.eup %1162 }
 0xa8e   :  { %v431_v20 = vadd.f32 1.0, %v1163_v19 }
 0xa90   :  { %1164 = vrcp.f32 %v431_v20  ;;  %v443_v18 = vand.u32 2147483648, %v431_v20  ;;  %vm437_vm12 = vweird.f32 %v431_v20  ;;  %v441_v27 = vand.u32 2147483647, %v431_v20 }
 0xa92   :  { %v444_v29 = vor.u32 1.1754944e-38, %v443_v18  ;;  %vm442_vm14 = vcmp.eq.f32.partialorder %v441_v27, 8.507059e+37 }
 0xa96   :  { %v1165_v22 = vpop.eup %1164 }
 0xa97   :  { %v433_v23 = vmul.f32 %v1165_v22, %v431_v20  ;;  %vm438_vm3 = vweird.f32 %v1165_v22 }
 0xa98   :  { %vm439_vm13 = vmor %vm437_vm12, %vm438_vm3 }
 0xa99   :  { %v434_v24 = vsub.f32 1.0, %v433_v23 }
 0xa9b   :  { %v435_v25 = vmul.f32 %v1165_v22, %v434_v24 }
 0xa9d   :  { %v436_v26 = vadd.f32 %v1165_v22, %v435_v25 }
 0xa9f   :  { %v440_v28 = vsel %vm439_vm13, %v1165_v22, %v436_v26 }
 0xaa0   :  { %v445_v31 = vsel %vm442_vm14, %v444_v29, %v440_v28 }
 0xaa1   :  { %v451_v34 = vmul.f32 %v449_v33, %v445_v31 }
 0xafe   :  { %v454_v30 = vpop.permute.xlu0 %453 }
 0xaff   :  { %v456_v32 = vmul.f32 %v454_v30, %v445_v31 }
 0xb01   :  { %458 = vrot.lane.b32.xlu1 %v456_v32, %s1225_s4 }
 0xb73   :  { %v459_v35 = vpop.permute.xlu1 %458 }
 0xb74   :  { %v461_v36 = vadd.f32 %v459_v35, %v451_v34 }
 0xb76   :  { %1166 = vtanh.f32 %v461_v36  ;;  %v518_v59 = vrot.slane %v461_v36, 6 }
 0xb7c   :  { %v1167_v37 = vpop.eup %1166 }
 0xb7d   :  { %464 = vrot.lane.b32.xlu2 %v1167_v37, %s1224_s19 }
 0xbd7   :  { %v465_v38 = vpop.permute.xlu2 %464 }
 0xbd8   :  { %v1440_v39 = vmul.f32 %v465_v38, %v445_v31 }
 0xbda   :  { %469 = vrot.lane.b32.xlu0 %v1440_v39, %s1225_s4 }
 0xc4c   :  { %v470_v40 = vpop.permute.xlu0 %469 }
 0xc4d   :  { %1077 = vmatmul.msk.f32.vlgmr.msra.gmra.mxu1 %vm130_vm8, %v470_v40 }
 0xcca   :  { %v490_v41 = vpop.f32.mrf.mxu1 }
 0xccb   :  { %v494_v42 = vrot.slane %v490_v41, 6 }
 0xccd   :  { %v496_v43 = vadd.f32 %v494_v42, %v1434_v12 }
 0xccf   :  { %1168 = vtanh.f32 %v496_v43  ;;  %v1078_v46 = vmul.f32 -1.442695, %v496_v43 }
 0xcd1   :  { %1170 = vpow2.f32 %v1078_v46 }
 0xcd5   :  { %v1169_v45 = vpop.eup %1168 }
 0xcd6   :  { %522 = vrot.lane.b32.xlu1 %v1169_v45, %s1224_s19 }
 0xcd7   :  { %v1171_v47 = vpop.eup %1170 }
 0xcd8   :  { %v500_v48 = vadd.f32 1.0, %v1171_v47 }
 0xcda   :  { %1172 = vrcp.f32 %v500_v48  ;;  %v512_v53 = vand.u32 2147483648, %v500_v48  ;;  %vm506_vm0 = vweird.f32 %v500_v48  ;;  %v510_v54 = vand.u32 2147483647, %v500_v48 }
 0xcdc   :  { %v513_v56 = vor.u32 1.1754944e-38, %v512_v53  ;;  %vm511_vm6 = vcmp.eq.f32.partialorder %v510_v54, 8.507059e+37 }
 0xce0   :  { %v1173_v49 = vpop.eup %1172 }
 0xce1   :  { %v502_v50 = vmul.f32 %v1173_v49, %v500_v48  ;;  %vm507_vm15 = vweird.f32 %v1173_v49 }
 0xce2   :  { %vm508_vm5 = vmor %vm506_vm0, %vm507_vm15  ;;  %vm847_vm0 = vcmask 113664  }
 0xce3   :  { %v503_v44 = vsub.f32 1.0, %v502_v50 }
 0xce5   :  { %v504_v51 = vmul.f32 %v1173_v49, %v503_v44 }
 0xce7   :  { %v505_v52 = vadd.f32 %v1173_v49, %v504_v51 }
 0xce9   :  { %v509_v55 = vsel %vm508_vm5, %v1173_v49, %v505_v52 }
 0xcea   :  { %v514_v57 = vsel %vm511_vm6, %v513_v56, %v509_v55  ;;  %v755_v55 = vld [vmem:[%s1625_s5 + $0x48] sm:$0xff]  ;;  %v756_v56 = vld [vmem:[%s1625_s5 + $0x50] sm:$0xff] }
 0xceb   :  { %v520_v60 = vmul.f32 %v518_v59, %v514_v57  ;;  %788 = vmatpush.msrb.mxu0 %v755_v55  ;;  %811 = vmatpush.msrb.mxu2 %v756_v56  ;;  %v749_v59 = vld [vmem:[%s1625_s5 + $0x18] sm:$0xff] }
 0xd48   :  { %v523_v21 = vpop.permute.xlu1 %522 }
 0xd49   :  { %v525_v58 = vmul.f32 %v523_v21, %v514_v57  ;;  %v757_v21 = vld [vmem:[%s1625_s5 + $0x58] sm:$0xff] }
 0xd4a   :  { %834 = vmatpush.msrb.mxu3 %v757_v21 }
 0xd4b   :  { %527 = vrot.lane.b32.xlu2 %v525_v58, %s1225_s4  ;;  %v754_v58 = vld [vmem:[%s1625_s5 + $0x40] sm:$0xff] }
 0xd4c   :  { %835 = vmatpush.msrb.mxu3 %v754_v58 }
 0xda5   :  { %v528_v61 = vpop.permute.xlu2 %527 }
 0xda6   :  { %v530_v62 = vadd.f32 %v528_v61, %v520_v60  ;;  %v750_v60 = vld [vmem:[%s1625_s5 + $0x20] sm:$0xff]  ;;  %v751_v61 = vld [vmem:[%s1625_s5 + $0x28] sm:$0xff] }
 0xda7   :  { %836 = vmatpush.msrb.mxu3 %v751_v61 }
 0xda8   :  { %1174 = vtanh.f32 %v530_v62  ;;  %v588_v18 = vrot.slane %v530_v62, 6  ;;  %v746_v62 = vld [vmem:[%s1625_s5] sm:$0xff] }
 0xdae   :  { %v1175_v63 = vpop.eup %1174 }
 0xdaf   :  { %533 = vrot.lane.b32.xlu0 %v1175_v63, %s1224_s19  ;;  %v747_v63 = vld [vmem:[%s1625_s5 + $0x8] sm:$0xff] }
 0xe21   :  { %v534_v0 = vpop.permute.xlu0 %533 }
 0xe22   :  { %v536_v1 = vmul.f32 %v534_v0, %v514_v57  ;;  %v752_v57 = vld [vmem:[%s1625_s5 + $0x30] sm:$0xff] }
 0xe23   :  { %789 = vmatpush.msrb.mxu0 %v752_v57  ;;  %v748_v0 = vld [vmem:[%s1625_s5 + $0x10] sm:$0xff] }
 0xe24   :  { %v538_v2 = vrot.slane %v536_v1, 2  ;;  %v683_v33 = vsel %vm677_vm2, %v1440_v39, %v536_v1  ;;  %837 = vmatpush.msrb.mxu3 %v748_v0  ;;  %v1230_v0 = vmov 9  }
 0xe25   :  { %790 = vmatpush.msrb.mxu0 %v749_v59 }
 0xe26   :  { %539 = vrot.lane.b32.xlu1 %v538_v2, %s1225_s4 }
 0xe27   :  { %791 = vmatpush.msrb.mxu0 %v746_v62  ;;  %v1228_v62 = vmov 8  }
 0xe98   :  { %v540_v3 = vpop.permute.xlu1 %539 }
 0xe99   :  { %1079 = vmatmul.msk.f32.vlgmr.msra.gmra.mxu2 %vm130_vm8, %v540_v3 }
 0xf1c   :  { %v560_v4 = vpop.f32.mrf.mxu2 }
 0xf1d   :  { %v564_v5 = vrot.slane %v560_v4, 4 }
 0xf1f   :  { %v566_v6 = vadd.f32 %v564_v5, %v1434_v12 }
 0xf21   :  { %1176 = vtanh.f32 %v566_v6  ;;  %v1080_v8 = vmul.f32 -1.442695, %v566_v6 }
 0xf23   :  { %1178 = vpow2.f32 %v1080_v8 }
 0xf27   :  { %v1177_v7 = vpop.eup %1176 }
 0xf28   :  { %592 = vrot.lane.b32.xlu2 %v1177_v7, %s1224_s19 }
 0xf29   :  { %v1179_v9 = vpop.eup %1178 }
 0xf2a   :  { %v570_v11 = vadd.f32 1.0, %v1179_v9 }
 0xf2c   :  { %1180 = vrcp.f32 %v570_v11  ;;  %v582_v19 = vand.u32 2147483648, %v570_v11  ;;  %vm576_vm9 = vweird.f32 %v570_v11  ;;  %v580_v20 = vand.u32 2147483647, %v570_v11 }
 0xf2e   :  { %v583_v23 = vor.u32 1.1754944e-38, %v582_v19  ;;  %vm581_vm3 = vcmp.eq.f32.partialorder %v580_v20, 8.507059e+37 }
 0xf32   :  { %v1181_v10 = vpop.eup %1180 }
 0xf33   :  { %v572_v14 = vmul.f32 %v1181_v10, %v570_v11  ;;  %vm577_vm7 = vweird.f32 %v1181_v10 }
 0xf34   :  { %vm578_vm10 = vmor %vm576_vm9, %vm577_vm7 }
 0xf35   :  { %v573_v15 = vsub.f32 1.0, %v572_v14 }
 0xf37   :  { %v574_v16 = vmul.f32 %v1181_v10, %v573_v15 }
 0xf39   :  { %v575_v17 = vadd.f32 %v1181_v10, %v574_v16 }
 0xf3b   :  { %v579_v22 = vsel %vm578_vm10, %v1181_v10, %v575_v17  ;;  %v758_v10 = vld [vmem:[%s1626_s6] sm:$0x7] }
 0xf3c   :  { %v584_v25 = vsel %vm581_vm3, %v583_v23, %v579_v22  ;;  %v760_v14 = vperm.slane %v758_v10, 0  ;;  %v761_v17 = vperm.slane %v758_v10, 1  ;;  %v762_v19 = vperm.slane %v758_v10, 2 }
 0xf3d   :  { %v590_v27 = vmul.f32 %v588_v18, %v584_v25  ;;  %v687_v18 = vld [vmem:[%s1627_s7 + $0x8] sm:$0xff] }
 0xf82   :  { %v593_v24 = vpop.permute.xlu2 %592 }
 0xf83   :  { %v595_v26 = vmul.f32 %v593_v24, %v584_v25 }
 0xf85   :  { %597 = vrot.lane.b32.xlu0 %v595_v26, %s1225_s4  ;;  %v688_v26 = vld [vmem:[%s1627_s7 + $0x10] sm:$0xff] }
 0xff7   :  { %v598_v28 = vpop.permute.xlu0 %597 }
 0xff8   :  { %v1454_v29 = vadd.f32 %v598_v28, %v590_v27  ;;  %v686_v27 = vld [vmem:[%s1627_s7] sm:$0xff] }
 0xffa   :  { %1182 = vtanh.f32 %v1454_v29  ;;  %v658_v1 = vrot.slane %v1454_v29, 6 }
0x1000   :  { %v1183_v30 = vpop.eup %1182 }
0x1001   :  { %603 = vrot.lane.b32.xlu1 %v1183_v30, %s1224_s19 }
0x1073   :  { %v604_v31 = vpop.permute.xlu1 %603 }
0x1074   :  { %v606_v32 = vmul.f32 %v604_v31, %v584_v25  ;;  %v689_v25 = vld [vmem:[%s1627_s7 + $0x18] sm:$0xff] }
0x1075   :  { %712 = vmatpush.msrb.mxu1 %v689_v25 }
0x1076   :  { %v608_v34 = vrot.slane %v606_v32, 4  ;;  %v1461_v35 = vsel %vm679_vm4, %v683_v33, %v606_v32 }
0x1077   :  { %713 = vmatpush.msrb.mxu1 %v688_v26 }
0x1078   :  { %609 = vrot.lane.b32.xlu2 %v608_v34, %s1225_s4 }
0x1079   :  { %714 = vmatpush.msrb.mxu1 %v687_v18 }
0x107b   :  { %715 = vmatpush.msrb.mxu1 %v686_v27 }
0x10d2   :  { %v610_v36 = vpop.permute.xlu2 %609 }
0x10d3   :  { %1081 = vmatmul.msk.f32.vlgmr.msra.gmra.mxu3 %vm130_vm8, %v610_v36  ;;  %v1127_v36 = vld [vmem:[%s1628_s8] ss:$0 sm:$0xff]  ;;  %s1235_s8 = smov 101  }
0x1156   :  { %v630_v37 = vpop.f32.mrf.mxu3 }
0x1157   :  { %v634_v38 = vrot.slane %v630_v37, 2 }
0x1159   :  { %v636_v40 = vadd.f32 %v634_v38, %v1434_v12 }
0x115b   :  { %1184 = vtanh.f32 %v636_v40  ;;  %v1082_v42 = vmul.f32 -1.442695, %v636_v40 }
0x115d   :  { %1186 = vpow2.f32 %v1082_v42 }
0x1161   :  { %v1185_v41 = vpop.eup %1184 }
0x1162   :  { %662 = vrot.lane.b32.xlu0 %v1185_v41, %s1224_s19 }
0x1163   :  { %v1187_v39 = vpop.eup %1186 }
0x1164   :  { %v640_v43 = vadd.f32 1.0, %v1187_v39 }
0x1166   :  { %1188 = vrcp.f32 %v640_v43  ;;  %v652_v50 = vand.u32 2147483648, %v640_v43  ;;  %vm646_vm13 = vweird.f32 %v640_v43  ;;  %v650_v44 = vand.u32 2147483647, %v640_v43 }
0x1168   :  { %v653_v51 = vor.u32 1.1754944e-38, %v652_v50  ;;  %vm651_vm15 = vcmp.eq.f32.partialorder %v650_v44, 8.507059e+37 }
0x116c   :  { %v1189_v45 = vpop.eup %1188 }
0x116d   :  { %v642_v46 = vmul.f32 %v1189_v45, %v640_v43  ;;  %vm647_vm12 = vweird.f32 %v1189_v45 }
0x116e   :  { %vm648_vm14 = vmor %vm646_vm13, %vm647_vm12 }
0x116f   :  { %v643_v47 = vsub.f32 1.0, %v642_v46  ;;  %v1226_v46 = vmov 6  }
0x1170   :  { %1121 = vset.pattern.permute.xlu0 %v1226_v46 }
0x1171   :  { %v644_v48 = vmul.f32 %v1189_v45, %v643_v47  ;;  %v1227_v47 = vmov 3  }
0x1172   :  { %1118 = vset.pattern.permute.xlu1 %v1227_v47 }
0x1173   :  { %v645_v49 = vadd.f32 %v1189_v45, %v644_v48 }
0x1175   :  { %v649_v12 = vsel %vm648_vm14, %v1189_v45, %v645_v49 }
0x1176   :  { %v654_v53 = vsel %vm651_vm15, %v653_v51, %v649_v12 }
0x1177   :  { %v660_v2 = vmul.f32 %v658_v1, %v654_v53  ;;  %v1231_v1 = vmov 2  }
0x11d4   :  { %v663_v52 = vpop.permute.xlu0 %662 }
0x11d5   :  { %v665_v54 = vmul.f32 %v663_v52, %v654_v53 }
0x11d7   :  { %667 = vrot.lane.b32.xlu1 %v665_v54, %s1225_s4 }
0x11df   :  { %768 = vrot.lane.b32.xlu1 %v1429_v13, %s1225_s4  ;;  %v753_v13 = vld [vmem:[%s1625_s5 + $0x38] sm:$0xff]  ;;  %s1240_s5 = smov 94  }
0x11e0   :  { %812 = vmatpush.msrb.mxu2 %v753_v13 }
0x11e2   :  { %813 = vmatpush.msrb.mxu2 %v750_v60 }
0x11e4   :  { %814 = vmatpush.msrb.mxu2 %v747_v63  ;;  %v1229_v63 = vmov 1  }
0x1249   :  { %v668_v3 = vpop.permute.xlu1 %667 }
0x124a   :  { %v670_v4 = vadd.f32 %v668_v3, %v660_v2  ;;  %v1232_v2 = vmov 4   ;;  %v1233_v3 = vmov 5  }
0x124c   :  { %1190 = vtanh.f32 %v670_v4  ;;  %v1234_v4 = vmov 7  }
0x1251   :  { %v769_v5 = vpop.permute.xlu1 %768 }
0x1252   :  { %v1191_v6 = vpop.eup %1190  ;;  %1084 = vmatmul.msk.f32.vlgmr.msrb.gmra.mxu0 %vm130_vm8, %v769_v5  ;;  %1086 = vmatmul.msk.f32.vlgmr.msrb.gmra.mxu2 %vm130_vm8, %v769_v5 }
0x1253   :  { %1088 = vmatmul.msk.f32.vlgmr.msrb.gmra.mxu3 %vm130_vm8, %v769_v5  ;;  %673 = vrot.lane.b32.xlu2 %v1191_v6, %s1224_s19  ;;  %s1242_s19 = smov [#allocation2]  }
0x1254   :  { %s1046_s24 = sshll.u32 %s1242_s19, 4  ;;  %s1047_s24 = int_to_ptr.vmem [resolvable:$true] %s1046_s24 }
0x12ad   :  { %v674_v7 = vpop.permute.xlu2 %673 }
0x12ae   :  { %v676_v8 = vmul.f32 %v674_v7, %v654_v53 }
0x12b0   :  { %v695_v9 = vrot.slane %v676_v8, 6  ;;  %v685_v11 = vsel %vm681_vm11, %v1461_v35, %v676_v8 }
0x12b1   :  { %770 = vrot.lane.b32.xlu2 %v685_v11, %s1225_s4 }
0x12b2   :  { %696 = vrot.lane.b32.xlu0 %v695_v9, %s1225_s4 }
0x12cf   :  { %v793_v15 = vpop.f32.mrf.mxu0 }
0x12d0   :  { %v1518_v16 = vadd.f32 %v793_v15, %v760_v14 }
0x12d2   :  { %845 = vst [vmem:[%s1629_s9] sm:$0xff] %v1518_v16 }
0x12d5   :  { %v816_v20 = vpop.f32.mrf.mxu2 }
0x12d6   :  { %v1524_v22 = vadd.f32 %v816_v20, %v761_v17  ;;  %v839_v23 = vpop.f32.mrf.mxu3 }
0x12d7   :  { %v1526_v24 = vadd.f32 %v839_v23, %v762_v19 }
0x12d8   :  { %846 = vst [vmem:[%s1629_s9 + $0x8] sm:$0xff] %v1524_v22 }
0x12d9   :  { %848 = vst.msk [vmem:[%s1629_s9 + $0x10] sm:$0xff] %vm847_vm0, %v1526_v24 }
0x130b   :  { %v771_v28 = vpop.permute.xlu2 %770 }
0x130c   :  { %1085 = vmatmul.msk.f32.gmra.mxu0 %vm130_vm8, %v771_v28  ;;  %1087 = vmatmul.msk.f32.gmra.mxu2 %vm130_vm8, %v771_v28 }
0x130d   :  { %1089 = vmatmul.msk.f32.gmra.mxu3 %vm130_vm8, %v771_v28 }
0x1324   :  { %v697_v29 = vpop.permute.xlu0 %696 }
0x1325   :  { %1083 = vmatmul.msk.f32.vlgmr.msrb.gmra.mxu1 %vm130_vm8, %v697_v29  ;;  %vm720_vm8 = vcmask 74752  }
0x1389   :  { %v796_v30 = vpop.f32.mrf.mxu0 }
0x138a   :  { %v1553_v31 = vadd.f32 %v796_v30, %v760_v14 }
0x138c   :  { %849 = vst [vmem:[%s1629_s9 + $0x18] sm:$0xff] %v1553_v31 }
0x138f   :  { %v819_v32 = vpop.f32.mrf.mxu2 }
0x1390   :  { %v1559_v33 = vadd.f32 %v819_v32, %v761_v17  ;;  %v842_v34 = vpop.f32.mrf.mxu3 }
0x1391   :  { %v1561_v35 = vadd.f32 %v842_v34, %v762_v19 }
0x1392   :  { %850 = vst [vmem:[%s1629_s9 + $0x20] sm:$0xff] %v1559_v33 }
0x1393   :  { %851 = vst.msk [vmem:[%s1629_s9 + $0x28] sm:$0xff] %vm847_vm0, %v1561_v35  ;;  %s1236_s9 = smov 74  }
0x13a2   :  { %v717_v37 = vpop.f32.mrf.mxu1 }
0x13a3   :  { %v718_v38 = vadd.f32 %v1127_v36, %v717_v37 }
0x13a5   :  { %v721_v40 = vsel %vm720_vm8, %v718_v38, -inf }
0x13a6   :  { %722 = vmax.xlane.f32.xlu0 %v721_v40 }
0x1419   :  { %v723_v41 = vpop.xlane.xlu0 %722 }
0x141a   :  { %v724_v42 = vsub.f32 %v718_v38, %v723_v41 }
0x141c   :  { %v725_v39 = vmul.f32 1.442695, %v724_v42 }
0x141e   :  { %1192 = vpow2.f32 %v725_v39 }
0x1424   :  { %v1193_v43 = vpop.eup %1192 }
0x1425   :  { %v727_v45 = vsel %vm720_vm8, %v1193_v43, 0.0 }
0x1426   :  { %728 = vadd.xlane.f32.xlu1 %v727_v45 }
0x1499   :  { %v729_v48 = vpop.xlane.xlu1 %728 }
0x149a   :  { %1194 = vrcp.f32 %v729_v48  ;;  %v741_v12 = vand.u32 2147483648, %v729_v48  ;;  %v739_v52 = vand.u32 2147483647, %v729_v48  ;;  %vm735_vm6 = vweird.f32 %v729_v48 }
0x149c   :  { %v742_v54 = vor.u32 1.1754944e-38, %v741_v12  ;;  %vm740_vm9 = vcmp.eq.f32.partialorder %v739_v52, 8.507059e+37 }
0x14a0   :  { %v1195_v49 = vpop.eup %1194 }
0x14a1   :  { %v731_v50 = vmul.f32 %v1195_v49, %v729_v48  ;;  %vm736_vm5 = vweird.f32 %v1195_v49 }
0x14a2   :  { %vm737_vm7 = vmor %vm735_vm6, %vm736_vm5 }
0x14a3   :  { %v732_v44 = vsub.f32 1.0, %v731_v50 }
0x14a5   :  { %v733_v51 = vmul.f32 %v1195_v49, %v732_v44 }
0x14a7   :  { %v734_v53 = vadd.f32 %v1195_v49, %v733_v51 }
0x14a9   :  { %v738_v55 = vsel %vm737_vm7, %v1195_v49, %v734_v53 }
0x14aa   :  { %v743_v56 = vsel %vm740_vm9, %v742_v54, %v738_v55 }
0x14ab   :  { %v744_v21 = vmul.f32 %v1193_v43, %v743_v56 }
0x14ad   :  { %v853_v57 = vrot.slane %v744_v21, 6  ;;  %v855_v13 = vrot.slane %v744_v21, 4  ;;  %745 = vst.msk [vmem:[#allocation2] sm:$0x3] %vm720_vm8, %v744_v21  ;;  %v857_v58 = vrot.slane %v744_v21, 2 }
0x14ae   :  { %1051 = dma.vmem_to_hbm [thread:$0]  %s1047_s24, 32, %s1049_s25, [#allocation3]  }
0x14af   :  { %v859_v59 = vsel %vm677_vm2, %v744_v21, %v853_v57  ;;  %vm937_vm2 = vcmask 162816  }
0x14b0   :  { %v860_v60 = vsel %vm679_vm4, %v859_v59, %v855_v13  ;;  %vm1028_vm4 = vcmask 105472  }
0x14b1   :  { %v861_v61 = vsel %vm681_vm11, %v860_v60, %v857_v58 }
0x14b2   :  { %961 = vperm.xlu0 %1121, %v861_v61   ;;  %902 = vperm.xlu1 %1118, %v861_v61  }
0x14b3   :  { %864 = vperm.xlu2 %1115, %v861_v61  }
0x14ba   :  { %1123 = vset.pattern.permute.xlu1 %v1228_v62  ;;  %1125 = vset.pattern.permute.xlu0 %v1230_v0 }
0x14bb   :  { %1116 = vset.pattern.permute.xlu2 %v1229_v63  ;;  %993 = vperm.xlu1 %1123, %v861_v61  }
0x14bc   :  { %870 = vperm.xlu2 %1116, %v861_v61  }
0x14c4   :  { %1117 = vset.pattern.permute.xlu2 %v1231_v1 }
0x14c5   :  { %886 = vperm.xlu2 %1117, %v861_v61  }
0x14cd   :  { %1119 = vset.pattern.permute.xlu2 %v1232_v2 }
0x14ce   :  { %918 = vperm.xlu2 %1119, %v861_v61  }
0x14d6   :  { %1120 = vset.pattern.permute.xlu2 %v1233_v3 }
0x14d7   :  { %945 = vperm.xlu2 %1120, %v861_v61  }
0x14df   :  { %1122 = vset.pattern.permute.xlu2 %v1234_v4 }
0x14e0   :  { %977 = vperm.xlu2 %1122, %v861_v61  }
0x14e8   :  { %1124 = vset.pattern.permute.xlu2 %v1230_v0 }
0x14e9   :  { %1009 = vperm.xlu2 %1124, %v861_v61  }
0x150d   :  { %v1581_v5 = vpop.permute.xlu2 %864 }
0x150e   :  { %v868_v57 = vmul.f32 %v1581_v5, %v1553_v31 }
0x1516   :  { %v871_v6 = vpop.permute.xlu2 %870 }
0x1517   :  { %v873_v7 = vmul.f32 %v871_v6, %v1518_v16  ;;  %v874_v8 = vmul.f32 %v871_v6, %v1553_v31 }
0x1519   :  { %877 = vrot.lane.b32.xlu2 %v873_v7, %s1235_s8 }
0x151f   :  { %v887_v9 = vpop.permute.xlu2 %886 }
0x1520   :  { %v890_v11 = vmul.f32 %v887_v9, %v1553_v31  ;;  %v889_v15 = vmul.f32 %v887_v9, %v1518_v16 }
0x1521   :  { %879 = vrot.lane.b32.xlu2 %v874_v8, %s1235_s8 }
0x1522   :  { %895 = vrot.lane.b32.xlu0 %v890_v11, %s1236_s9 }
0x1524   :  { %v903_v10 = vpop.permute.xlu1 %902  ;;  %v962_v29 = vpop.permute.xlu0 %961 }
0x1525   :  { %v905_v14 = vmul.f32 %v903_v10, %v1518_v16  ;;  %v906_v17 = vmul.f32 %v903_v10, %v1553_v31  ;;  %v965_v30 = vmul.f32 %v962_v29, %v1559_v33  ;;  %v964_v34 = vmul.f32 %v962_v29, %v1524_v22 }
0x1527   :  { %909 = vrot.lane.b32.xlu1 %v905_v14, %s1237_s21 }
0x1528   :  { %v919_v19 = vpop.permute.xlu2 %918 }
0x1529   :  { %893 = vrot.lane.b32.xlu2 %v889_v15, %s1236_s9  ;;  %v922_v20 = vmul.f32 %v919_v19, %v1524_v22  ;;  %v921_v23 = vmul.f32 %v919_v19, %v1518_v16  ;;  %v923_v25 = vmul.f32 %v919_v19, %v1553_v31  ;;  %v924_v27 = vmul.f32 %v919_v19, %v1559_v33 }
0x152a   :  { %911 = vrot.lane.b32.xlu0 %v906_v17, %s1237_s21 }
0x152d   :  { %v994_v37 = vpop.permute.xlu1 %993 }
0x152e   :  { %v996_v38 = vmul.f32 %v994_v37, %v1524_v22  ;;  %v997_v41 = vmul.f32 %v994_v37, %v1559_v33 }
0x152f   :  { %931 = vrot.lane.b32.xlu1 %v922_v20, %s1238_s0 }
0x1531   :  { %929 = vrot.lane.b32.xlu2 %v921_v23, %s1238_s0  ;;  %v946_v26 = vpop.permute.xlu2 %945 }
0x1532   :  { %933 = vrot.lane.b32.xlu0 %v923_v25, %s1238_s0  ;;  %v948_v18 = vmul.f32 %v946_v26, %v1524_v22  ;;  %v949_v28 = vmul.f32 %v946_v26, %v1559_v33 }
0x1537   :  { %952 = vrot.lane.b32.xlu1 %v948_v18, %s1239_s22 }
0x1539   :  { %935 = vrot.lane.b32.xlu2 %v924_v27, %s1238_s0 }
0x153a   :  { %954 = vrot.lane.b32.xlu0 %v949_v28, %s1239_s22  ;;  %v978_v32 = vpop.permute.xlu2 %977 }
0x153b   :  { %v980_v36 = vmul.f32 %v978_v32, %v1524_v22  ;;  %v981_v40 = vmul.f32 %v978_v32, %v1559_v33 }
0x153f   :  { %970 = vrot.lane.b32.xlu1 %v965_v30, %s1240_s5 }
0x1541   :  { %968 = vrot.lane.b32.xlu2 %v964_v34, %s1240_s5 }
0x1542   :  { %984 = vrot.lane.b32.xlu0 %v980_v36, %s1241_s23 }
0x1543   :  { %v1010_v42 = vpop.permute.xlu2 %1009 }
0x1544   :  { %v1013_v39 = vmul.f32 %v1010_v42, %v1526_v24  ;;  %v1012_v43 = vmul.f32 %v1010_v42, %v1524_v22  ;;  %v1014_v45 = vmul.f32 %v1010_v42, %v1559_v33  ;;  %v1015_v46 = vmul.f32 %v1010_v42, %v1561_v35 }
0x1545   :  { %v867_v33 = vmul.f32 %v1581_v5, %v1518_v16 }
0x1547   :  { %1000 = vrot.lane.b32.xlu1 %v996_v38, %s1243_s26 }
0x1549   :  { %986 = vrot.lane.b32.xlu2 %v981_v40, %s1241_s23 }
0x154a   :  { %1002 = vrot.lane.b32.xlu0 %v997_v41, %s1243_s26 }
0x154f   :  { %1022 = vrot.lane.b32.xlu1 %v1013_v39, %s1244_s27 }
0x1551   :  { %1020 = vrot.lane.b32.xlu2 %v1012_v43, %s1244_s27 }
0x1552   :  { %1024 = vrot.lane.b32.xlu0 %v1014_v45, %s1244_s27 }
0x1559   :  { %1026 = vrot.lane.b32.xlu2 %v1015_v46, %s1244_s27 }
0x1573   :  { %v878_v47 = vpop.permute.xlu2 %877 }
0x1574   :  { %v883_v21 = vadd.f32 %v878_v47, %v867_v33 }
0x157b   :  { %v880_v48 = vpop.permute.xlu2 %879 }
0x157c   :  { %v884_v58 = vadd.f32 %v880_v48, %v868_v57 }
0x1583   :  { %v894_v49 = vpop.permute.xlu2 %893 }
0x1584   :  { %v899_v13 = vadd.f32 %v894_v49, %v883_v21 }
0x158b   :  { %v930_v50 = vpop.permute.xlu2 %929 }
0x1593   :  { %v936_v51 = vpop.permute.xlu2 %935 }
0x1594   :  { %v896_v44 = vpop.permute.xlu0 %895 }
0x1595   :  { %v900_v62 = vadd.f32 %v896_v44, %v884_v58 }
0x1599   :  { %v910_v12 = vpop.permute.xlu1 %909 }
0x159a   :  { %v915_v61 = vadd.f32 %v910_v12, %v899_v13 }
0x159b   :  { %v969_v54 = vpop.permute.xlu2 %968 }
0x159c   :  { %v912_v52 = vpop.permute.xlu0 %911 }
0x159d   :  { %v916_v1 = vadd.f32 %v912_v52, %v900_v62 }
0x15a1   :  { %v932_v24 = vpop.permute.xlu1 %931 }
0x15a2   :  { %v938_v59 = vsel %vm937_vm2, %v930_v50, %v932_v24 }
0x15a3   :  { %v987_v56 = vpop.permute.xlu2 %986  ;;  %v942_v0 = vadd.f32 %v938_v59, %v915_v61 }
0x15a4   :  { %v934_v53 = vpop.permute.xlu0 %933 }
0x15a5   :  { %v939_v63 = vsel %vm937_vm2, %v934_v53, %v936_v51 }
0x15a6   :  { %v943_v16 = vadd.f32 %v939_v63, %v916_v1 }
0x15a9   :  { %v953_v55 = vpop.permute.xlu1 %952 }
0x15aa   :  { %v958_v2 = vadd.f32 %v953_v55, %v942_v0 }
0x15ab   :  { %v1021_v4 = vpop.permute.xlu2 %1020 }
0x15ac   :  { %v955_v22 = vpop.permute.xlu0 %954  ;;  %v974_v8 = vadd.f32 %v969_v54, %v958_v2 }
0x15ad   :  { %v959_v6 = vadd.f32 %v955_v22, %v943_v16 }
0x15b1   :  { %v971_v35 = vpop.permute.xlu1 %970 }
0x15b2   :  { %v975_v9 = vadd.f32 %v971_v35, %v959_v6 }
0x15b3   :  { %v1027_v17 = vpop.permute.xlu2 %1026 }
0x15b4   :  { %v985_v60 = vpop.permute.xlu0 %984  ;;  %v991_v10 = vadd.f32 %v987_v56, %v975_v9 }
0x15b5   :  { %v990_v11 = vadd.f32 %v985_v60, %v974_v8 }
0x15b9   :  { %v1001_v3 = vpop.permute.xlu1 %1000 }
0x15ba   :  { %v1006_v31 = vadd.f32 %v1001_v3, %v990_v11 }
0x15bc   :  { %v1003_v7 = vpop.permute.xlu0 %1002 }
0x15bd   :  { %v1007_v19 = vadd.f32 %v1003_v7, %v991_v10 }
0x15c1   :  { %v1023_v5 = vpop.permute.xlu1 %1022 }
0x15c2   :  { %v1029_v14 = vsel %vm1028_vm4, %v1021_v4, %v1023_v5 }
0x15c3   :  { %v1033_v15 = vadd.f32 %v1029_v14, %v1006_v31 }
0x15c4   :  { %v1025_v20 = vpop.permute.xlu0 %1024 }
0x15c5   :  { %1035 = vst.msk [vmem:[%s1630_s10] sm:$0xff] %vm56_vm1, %v1033_v15  ;;  %v1030_v23 = vsel %vm1028_vm4, %v1025_v20, %v1027_v17 }
0x15c6   :  { %v1034_v25 = vadd.f32 %v1030_v23, %v1007_v19 }
0x15c8   :  { %1036 = vst.msk [vmem:[%s1630_s10 + $0x8] sm:$0xff] %vm56_vm1, %v1034_v25 }
0x15c9   :  { %1220 = dma.done.wait [#allocation3], 32  }
0x15ca   :  { %1221 = vsyncadd [#allocation3], 4294967264 }
0x15cb   :  { %1060 = vsyncpa [#allocation3], 1 }

</bundles_post_ra>
